<compile_context>
chip_gen: v7x
topology: tpu7x:2x2x1
jax: 0.10.0
libtpu: 0.0.40
codegen_flags: <defaults>
</compile_context>

<pallas_src>
import functools
from typing import NamedTuple, Optional, Tuple

import jax
import jax.numpy as jnp
from jax import lax
from jax.experimental import pallas as pl
from jax.experimental.pallas import tpu as pltpu


# ----------------------------------------------------------------------------
# Static per-layer description (built at prep time, closed over by the kernel).
# ----------------------------------------------------------------------------
class LayerSpec(NamedTuple):
    banded: bool
    g: int                     # number of output-row groups (1 if dense)
    kb: int                    # contraction width (lanes) per group
    nb: int                    # output columns per group
    starts: Tuple[int, ...]    # input lane offset of each group's band
    act: Optional[str]
    slope: float
    out_dim: int


# ----------------------------------------------------------------------------
# Fused Pallas kernel: whole generator = chain of (GEMM(+banded) + bias + act).
# ----------------------------------------------------------------------------
def _activation(h, act, slope):
    if act == "leaky_relu":
        return jnp.maximum(h, slope * h)                 # slope in (0, 1)
    if act == "sigmoid":
        # exp on the EUP; approx reciprocal keeps the divide off the VALU.
        return pl.reciprocal(1.0 + jnp.exp(-h), approx=True)
    return h


def _banded_matmul(h, m_ref, spec, global_groups):
    """Per output-row-pair GEMMs against band-trimmed weight blocks."""
    pieces = []
    for local, g in enumerate(global_groups):
        lo = spec.starts[g]                              # static lane offset
        band = h[:, lo:lo + spec.kb]
        pieces.append(jnp.dot(band.astype(jnp.bfloat16), m_ref[local],
                              preferred_element_type=jnp.float32))
    if len(pieces) == 1:
        return pieces[0]
    return jnp.concatenate(pieces, axis=-1)


def _fused_generator_kernel(*refs, layers, n_split):
    """refs = (z, M_0..M_{L-1}, b_0..b_{L-1}, out).

    Every layer is one (or a few banded) MXU matmuls with bf16 operands and
    f32 accumulation, a folded-BatchNorm bias add and the activation.
    Intermediates are small lane-dense 2-D f32 tensors resident in VMEM/vregs.
    """
    L = len(layers)
    z_ref = refs[0]
    m_refs = refs[1:1 + L]
    b_refs = refs[1 + L:1 + 2 * L]
    o_ref = refs[-1]

    h = z_ref[...].astype(jnp.float32)

    # All layers but the last: full-width, constant blocks across grid steps.
    for l in range(L - 1):
        spec = layers[l]
        if spec.banded:
            y = _banded_matmul(h, m_refs[l], spec, range(spec.g))
        else:
            y = jnp.dot(h.astype(jnp.bfloat16), m_refs[l][...],
                        preferred_element_type=jnp.float32)
        h = _activation(y + b_refs[l][...], spec.act, spec.slope)

    # Last layer: its output columns may be split over the grid (v7x only).
    spec = layers[-1]

    def last_step(step):
        if spec.banded:
            gps = spec.g // n_split
            groups = range(step * gps, (step + 1) * gps)
            y = _banded_matmul(h, m_refs[-1], spec, groups)
        else:
            y = jnp.dot(h.astype(jnp.bfloat16), m_refs[-1][...],
                        preferred_element_type=jnp.float32)
        y = _activation(y + b_refs[-1][...], spec.act, spec.slope)
        o_ref[...] = y.astype(o_ref.dtype)

    if n_split == 1:
        last_step(0)
    else:
        for step in range(n_split):
            @pl.when(pl.program_id(0) == step)
            def _(step=step):
                last_step(step)


# ----------------------------------------------------------------------------
# One-time parameter preparation (wrapper-side, XLA): ConvTranspose2d + folded
# BN scale -> structured GEMM matrix, band-trimmed for stride>1 layers.
# ----------------------------------------------------------------------------
def _convt_as_matrix(w_t, Hi, Wi, stride, padding):
    """M[(ih,iw,ci),(oh,ow,co)] = w_t[ci,co, oh-s*ih+p, ow-s*iw+p] if valid."""
    Cin, Cout, K, _ = w_t.shape
    s, p = stride, padding
    Ho = (Hi - 1) * s - 2 * p + K
    Wo = (Wi - 1) * s - 2 * p + K

    kh = jnp.arange(Ho)[None, :] - s * jnp.arange(Hi)[:, None] + p   # (Hi, Ho)
    kw = jnp.arange(Wo)[None, :] - s * jnp.arange(Wi)[:, None] + p   # (Wi, Wo)
    mh = (kh >= 0) & (kh < K)
    mw = (kw >= 0) & (kw < K)
    khc = jnp.clip(kh, 0, K - 1)
    kwc = jnp.clip(kw, 0, K - 1)

    Wg = w_t[:, :, khc][:, :, :, :, kwc]                 # (Cin,Cout,Hi,Ho,Wi,Wo)
    Wg = Wg * (mh[:, :, None, None] & mw[None, None, :, :])[None, None]
    M = jnp.transpose(Wg, (2, 4, 0, 3, 5, 1))            # (Hi,Wi,Cin,Ho,Wo,Cout)
    return M.reshape(Hi * Wi * Cin, Ho * Wo * Cout), (Ho, Wo, Cout)


def _band_plan(Hi, Ho, K, s, p, rows_per_group=2):
    """For each group of output rows, which contiguous band of input rows can
    contribute.  Returns (num_groups, band_rows, start_row_per_group)."""
    if Ho % rows_per_group:
        return None
    G = Ho // rows_per_group
    needed = []
    for g in range(G):
        ihs = []
        for oh in range(g * rows_per_group, (g + 1) * rows_per_group):
            for kh in range(K):
                num = oh + p - kh
                if num % s == 0 and 0 <= num // s < Hi:
                    ihs.append(num // s)
        if not ihs:
            return None
        needed.append((min(ihs), max(ihs)))
    B = max(hi - lo + 1 for lo, hi in needed)
    if B >= Hi:                                   # banding removes nothing
        return None
    starts = tuple(min(max(lo, 0), Hi - B) for lo, _ in needed)
    return G, B, starts


def prepare_generator(params, strides, padding, acts, slopes=None,
                      in_hw=(1, 1), rows_per_group=2):
    """Fold every layer (ConvT + BN scale) to bf16 GEMM blocks + f32 bias.

    NOTE: a prep-time fusion of consecutive layers (M01 = M0 @ M1) is only
    legal when the first of the two has NO BatchNorm/activation; with the
    standard DCGAN config used here every layer has a nonlinearity, so it is
    intentionally not applied.
    """
    Hi, Wi = in_hw
    depth = len(params)
    slopes = slopes if slopes is not None else [0.2] * depth
    mats, biases, specs = [], [], []
    for i, prm in enumerate(params):
        Cin = prm["w"].shape[0]
        K = prm["w"].shape[-1]
        s, p = strides[i], padding[i]
        M, (Ho, Wo, Cout) = _convt_as_matrix(prm["w"], Hi, Wi, s, p)
        scale_vec = jnp.tile(prm["scale"].astype(jnp.float32), Ho * Wo)
        bias_vec = jnp.tile(prm["bias"].astype(jnp.float32), Ho * Wo)
        M = M * scale_vec[None, :]                        # fold BN scale (f32)
        out_dim = Ho * Wo * Cout

        plan = _band_plan(Hi, Ho, K, s, p, rows_per_group) if s > 1 else None
        if plan is not None:
            G, B, row_starts = plan
            kb = B * Wi * Cin
            nb = rows_per_group * Wo * Cout
            blocks = [M[r * Wi * Cin:r * Wi * Cin + kb, g * nb:(g + 1) * nb]
                      for g, r in enumerate(row_starts)]
            Mb = jnp.stack(blocks, axis=0)                # (G, kb, nb) f32
            # Sanity: nothing outside the kept bands may be nonzero.
            total = float(jnp.abs(M).sum())
            lost = total - float(jnp.abs(Mb).sum())
            assert abs(lost) <= 1e-5 * total + 1e-6, lost
            mats.append(Mb.astype(jnp.bfloat16))
            specs.append(LayerSpec(True, G, kb, nb,
                                   tuple(r * Wi * Cin for r in row_starts),
                                   acts[i], float(slopes[i]), out_dim))
        else:
            mats.append(M.astype(jnp.bfloat16))
            specs.append(LayerSpec(False, 1, M.shape[0], out_dim, (0,),
                                   acts[i], float(slopes[i]), out_dim))
        biases.append(bias_vec.reshape(1, out_dim))
        Hi, Wi = Ho, Wo
    return {"mats": mats, "biases": biases, "specs": tuple(specs),
            "out_hwc": (Ho, Wo, Cout)}


# ----------------------------------------------------------------------------
# Chip-dependent grid split: 2 only on v7x (2 TensorCores per chip).
# ----------------------------------------------------------------------------
def _pick_n_split(last_spec, out_dim):
    try:
        kind = jax.devices()[0].device_kind.lower()
    except Exception:
        return 1
    if not (("v7" in kind) or ("7x" in kind)):
        return 1                                  # v5e / v6e: 1 TC -> no split
    if last_spec.banded:
        if last_spec.g % 2 == 0 and ((last_spec.g // 2) * last_spec.nb) % 128 == 0:
            return 2
    else:
        if out_dim % 256 == 0:
            return 2
    return 1


# ----------------------------------------------------------------------------
# Forward: single fused pallas_call, NCHW only at the model boundary.
# ----------------------------------------------------------------------------
def latent_space_generator_forward(z_nchw, prep):
    mats, biases, specs = prep["mats"], prep["biases"], prep["specs"]
    Ho, Wo, Cout = prep["out_hwc"]
    L = len(mats)
    N = z_nchw.shape[0]
    out_dim = Ho * Wo * Cout
    last = specs[-1]

    # NCHW -> NHWC-flattened rows; pad the batch to a multiple of 8 so stores
    # are full-sublane and the MXU M dimension is better used.  Batching more
    # latents per call amortizes the (dominant) weight DMA nearly for free.
    z2 = jnp.transpose(z_nchw, (0, 2, 3, 1)).reshape(N, -1).astype(jnp.float32)
    npad = ((N + 7) // 8) * 8
    if npad != N:
        z2 = jnp.pad(z2, ((0, npad - N), (0, 0)))

    n_split = _pick_n_split(last, out_dim)

    def const_map(ndim):
        return lambda i: (0,) * ndim

    in_specs = [pl.BlockSpec(z2.shape, const_map(2))]
    for l in range(L):
        m = mats[l]
        if l == L - 1 and n_split > 1:
            if last.banded:
                blk = (last.g // n_split, m.shape[1], m.shape[2])
                in_specs.append(pl.BlockSpec(blk, lambda i: (i, 0, 0)))
            else:
                in_specs.append(pl.BlockSpec((m.shape[0], m.shape[1] // n_split),
                                             lambda i: (0, i)))
        else:
            in_specs.append(pl.BlockSpec(m.shape, const_map(m.ndim)))
    for l in range(L):
        b = biases[l]
        if l == L - 1 and n_split > 1:
            in_specs.append(pl.BlockSpec((1, out_dim // n_split),
                                         lambda i: (0, i)))
        else:
            in_specs.append(pl.BlockSpec(b.shape, const_map(2)))

    out_cols = out_dim // n_split
    out_index = (lambda i: (0, i)) if n_split > 1 else const_map(2)
    out_specs = pl.BlockSpec((npad, out_cols), out_index)

    kernel = functools.partial(_fused_generator_kernel,
                               layers=specs, n_split=n_split)
    out = pl.pallas_call(
        kernel,
        out_shape=jax.ShapeDtypeStruct((npad, out_dim), jnp.float32),
        grid=(n_split,),
        in_specs=in_specs,
        out_specs=out_specs,
        compiler_params=pltpu.CompilerParams(
            dimension_semantics=("parallel",),
            vmem_limit_bytes=32 * 1024 * 1024),
    )(z2, *mats, *biases)

    # Lane-dense (Npad, Ho*Wo*Cout) slab -> NCHW once, at the model boundary.
    out = out[:N].reshape(N, Ho, Wo, Cout)
    return jnp.transpose(out, (0, 3, 1, 2))


# ----------------------------------------------------------------------------
# Parameter init (PyTorch ConvTranspose2d weight layout + folded BN stats).
# ----------------------------------------------------------------------------
def init_generator_params(key, channels, kernel_sizes):
    depth = len(kernel_sizes)
    params = []
    for i in range(depth):
        cin, cout, k = channels[i], channels[i + 1], kernel_sizes[i]
        key, kw_, kg, kb, km, kv = jax.random.split(key, 6)
        w = 0.05 * jax.random.normal(kw_, (cin, cout, k, k), jnp.float32)
        has_bn = i < depth - 1       # DCGAN: BatchNorm on every layer but last
        if has_bn:
            gamma = 1.0 + 0.1 * jax.random.normal(kg, (cout,), jnp.float32)
            beta = 0.1 * jax.random.normal(kb, (cout,), jnp.float32)
            r_mean = 0.05 * jax.random.normal(km, (cout,), jnp.float32)
            r_var = 1.0 + 0.1 * jax.random.uniform(kv, (cout,), jnp.float32)
            eps = 1e-5
            scale = gamma / jnp.sqrt(r_var + eps)
            bias = beta - r_mean * scale
        else:
            scale = jnp.ones((cout,), jnp.float32)
            bias = jnp.zeros((cout,), jnp.float32)
        params.append({"w": w, "scale": scale, "bias": bias})
    return params


# ----------------------------------------------------------------------------
# Pure-JAX f32 reference (lax.conv_general_dilated) for correctness.
# ----------------------------------------------------------------------------
def _ref_layer(x, w_t, scale, bias, s, p, act, slope):
    K = w_t.shape[-1]
    wf = w_t[:, :, ::-1, ::-1]
    y = lax.conv_general_dilated(
        x, wf, window_strides=(1, 1),
        padding=[(K - 1 - p, K - 1 - p)] * 2,
        lhs_dilation=(s, s),
        dimension_numbers=("NCHW", "IOHW", "NCHW"))
    y = y * scale.reshape(1, -1, 1, 1) + bias.reshape(1, -1, 1, 1)
    if act == "leaky_relu":
        y = jnp.where(y > 0, y, slope * y)
    elif act == "sigmoid":
        y = jax.nn.sigmoid(y)
    return y


def _ref_forward(z, params, strides, padding, acts, slopes):
    x = z
    for i, prm in enumerate(params):
        x = _ref_layer(x, prm["w"], prm["scale"], prm["bias"],
                       strides[i], padding[i], acts[i], slopes[i])
    return x


if __name__ == "__main__":
    # DCGAN-ish small config: z (N, latent, 1, 1) -> (N, 4, 16, 16)
    channels = [32, 16, 8, 4]
    kernel_sizes = [4, 4, 4]
    strides = [1, 2, 2]
    padding = [0, 1, 1]
    depth = len(kernel_sizes)
    acts = ["leaky_relu"] * (depth - 1) + ["sigmoid"]   # BN+LeakyReLU inner, Sigmoid last
    slopes = [0.2] * depth

    key = jax.random.PRNGKey(0)
    key_z, key_p = jax.random.split(key)
    z = jax.random.normal(key_z, (2, channels[0], 1, 1), jnp.float32)
    params = init_generator_params(key_p, channels, kernel_sizes)
    prep = prepare_generator(params, strides, padding, acts, slopes)  # one-time

    fwd = jax.jit(lambda zz: latent_space_generator_forward(zz, prep))
    out = jax.block_until_ready(fwd(z))

    ref = jax.block_until_ready(
        _ref_forward(z, params, strides, padding, acts, slopes))

    assert out.shape == (2, channels[-1], 16, 16), out.shape
    max_err = float(jnp.max(jnp.abs(out - ref)))
    assert max_err < 2e-2, max_err          # bf16 matmuls vs f32 reference
    print("KERNEL_OK")
</pallas_src>

<mosaic_0001>
module attributes {stable_mosaic.version = 11 : i64} {
  func.func @_fused_generator_kernel(%arg0: i32, %arg1: memref<8x32xf32, #tpu.memory_space<vmem>>, %arg2: memref<32x256xbf16, #tpu.memory_space<vmem>>, %arg3: memref<4x192x128xbf16, #tpu.memory_space<vmem>>, %arg4: memref<8x192x128xbf16, #tpu.memory_space<vmem>>, %arg5: memref<1x256xf32, #tpu.memory_space<vmem>>, %arg6: memref<1x512xf32, #tpu.memory_space<vmem>>, %arg7: memref<1x1024xf32, #tpu.memory_space<vmem>>, %arg8: memref<8x1024xf32, #tpu.memory_space<vmem>>) attributes {dimension_semantics = [#tpu.dimension_semantics<parallel>], iteration_bounds = array<i64: 1>, scalar_prefetch = 0 : i64, scratch_operands = 0 : i64, tpu.core_type = #tpu.core_type<tc>, window_params = [{pipeline_mode = #tpu.pipeline_mode<synchronous>, transform_indices = @transform_0, window_bounds = array<i64: 8, 32>}, {pipeline_mode = #tpu.pipeline_mode<synchronous>, transform_indices = @transform_1, window_bounds = array<i64: 32, 256>}, {pipeline_mode = #tpu.pipeline_mode<synchronous>, transform_indices = @transform_2, window_bounds = array<i64: 4, 192, 128>}, {pipeline_mode = #tpu.pipeline_mode<synchronous>, transform_indices = @transform_3, window_bounds = array<i64: 8, 192, 128>}, {pipeline_mode = #tpu.pipeline_mode<synchronous>, transform_indices = @transform_4, window_bounds = array<i64: 1, 256>}, {pipeline_mode = #tpu.pipeline_mode<synchronous>, transform_indices = @transform_5, window_bounds = array<i64: 1, 512>}, {pipeline_mode = #tpu.pipeline_mode<synchronous>, transform_indices = @transform_6, window_bounds = array<i64: 1, 1024>}, {pipeline_mode = #tpu.pipeline_mode<synchronous>, transform_indices = @transform_7, window_bounds = array<i64: 8, 1024>}]} {
    %c0 = arith.constant 0 : index
    %c0_0 = arith.constant 0 : index
    %0 = vector.load %arg1[%c0, %c0_0] : memref<8x32xf32, #tpu.memory_space<vmem>>, vector<8x32xf32>
    %1 = arith.truncf %0 : vector<8x32xf32> to vector<8x32xbf16>
    %c0_1 = arith.constant 0 : index
    %c0_2 = arith.constant 0 : index
    %2 = vector.load %arg2[%c0_1, %c0_2] : memref<32x256xbf16, #tpu.memory_space<vmem>>, vector<32x256xbf16>
    %cst = arith.constant dense<0.000000e+00> : vector<8x256xf32>
    %3 = tpu.matmul %1, %2, %cst {dimension_numbers = #tpu.dot_dimension_numbers<[1], [0], [0], [1], [0, 0, 1, 1], [], []>} : vector<8x32xbf16>, vector<32x256xbf16>, vector<8x256xf32> -> vector<8x256xf32>
    %c0_3 = arith.constant 0 : index
    %c0_4 = arith.constant 0 : index
    %4 = vector.load %arg5[%c0_3, %c0_4] : memref<1x256xf32, #tpu.memory_space<vmem>>, vector<1x256xf32>
    %5 = vector.broadcast %4 : vector<1x256xf32> to vector<8x256xf32>
    %6 = arith.addf %3, %5 : vector<8x256xf32>
    %cst_5 = arith.constant 2.000000e-01 : f32
    %7 = vector.broadcast %cst_5 : f32 to vector<8x256xf32>
    %8 = arith.mulf %7, %6 : vector<8x256xf32>
    %9 = arith.maximumf %6, %8 : vector<8x256xf32>
    %10 = vector.extract_strided_slice %9 {offsets = [0, 0], sizes = [8, 192], strides = [1, 1]} : vector<8x256xf32> to vector<8x192xf32>
    %11 = arith.truncf %10 : vector<8x192xf32> to vector<8x192xbf16>
    %c0_6 = arith.constant 0 : index
    %c0_7 = arith.constant 0 : index
    %c0_8 = arith.constant 0 : index
    %12 = vector.load %arg3[%c0_6, %c0_7, %c0_8] : memref<4x192x128xbf16, #tpu.memory_space<vmem>>, vector<1x192x128xbf16>
    %13 = vector.shape_cast %12 : vector<1x192x128xbf16> to vector<192x128xbf16>
    %cst_9 = arith.constant dense<0.000000e+00> : vector<8x128xf32>
    %14 = tpu.matmul %11, %13, %cst_9 {dimension_numbers = #tpu.dot_dimension_numbers<[1], [0], [0], [1], [0, 0, 1, 1], [], []>} : vector<8x192xbf16>, vector<192x128xbf16>, vector<8x128xf32> -> vector<8x128xf32>
    %15 = vector.extract_strided_slice %9 {offsets = [0, 0], sizes = [8, 192], strides = [1, 1]} : vector<8x256xf32> to vector<8x192xf32>
    %16 = arith.truncf %15 : vector<8x192xf32> to vector<8x192xbf16>
    %c1 = arith.constant 1 : index
    %c0_10 = arith.constant 0 : index
    %c0_11 = arith.constant 0 : index
    %17 = vector.load %arg3[%c1, %c0_10, %c0_11] : memref<4x192x128xbf16, #tpu.memory_space<vmem>>, vector<1x192x128xbf16>
    %18 = vector.shape_cast %17 : vector<1x192x128xbf16> to vector<192x128xbf16>
    %cst_12 = arith.constant dense<0.000000e+00> : vector<8x128xf32>
    %19 = tpu.matmul %16, %18, %cst_12 {dimension_numbers = #tpu.dot_dimension_numbers<[1], [0], [0], [1], [0, 0, 1, 1], [], []>} : vector<8x192xbf16>, vector<192x128xbf16>, vector<8x128xf32> -> vector<8x128xf32>
    %20 = vector.extract_strided_slice %9 {offsets = [0, 64], sizes = [8, 192], strides = [1, 1]} : vector<8x256xf32> to vector<8x192xf32>
    %21 = arith.truncf %20 : vector<8x192xf32> to vector<8x192xbf16>
    %c2 = arith.constant 2 : index
    %c0_13 = arith.constant 0 : index
    %c0_14 = arith.constant 0 : index
    %22 = vector.load %arg3[%c2, %c0_13, %c0_14] : memref<4x192x128xbf16, #tpu.memory_space<vmem>>, vector<1x192x128xbf16>
    %23 = vector.shape_cast %22 : vector<1x192x128xbf16> to vector<192x128xbf16>
    %cst_15 = arith.constant dense<0.000000e+00> : vector<8x128xf32>
    %24 = tpu.matmul %21, %23, %cst_15 {dimension_numbers = #tpu.dot_dimension_numbers<[1], [0], [0], [1], [0, 0, 1, 1], [], []>} : vector<8x192xbf16>, vector<192x128xbf16>, vector<8x128xf32> -> vector<8x128xf32>
    %25 = vector.extract_strided_slice %9 {offsets = [0, 64], sizes = [8, 192], strides = [1, 1]} : vector<8x256xf32> to vector<8x192xf32>
    %26 = arith.truncf %25 : vector<8x192xf32> to vector<8x192xbf16>
    %c3 = arith.constant 3 : index
    %c0_16 = arith.constant 0 : index
    %c0_17 = arith.constant 0 : index
    %27 = vector.load %arg3[%c3, %c0_16, %c0_17] : memref<4x192x128xbf16, #tpu.memory_space<vmem>>, vector<1x192x128xbf16>
    %28 = vector.shape_cast %27 : vector<1x192x128xbf16> to vector<192x128xbf16>
    %cst_18 = arith.constant dense<0.000000e+00> : vector<8x128xf32>
    %29 = tpu.matmul %26, %28, %cst_18 {dimension_numbers = #tpu.dot_dimension_numbers<[1], [0], [0], [1], [0, 0, 1, 1], [], []>} : vector<8x192xbf16>, vector<192x128xbf16>, vector<8x128xf32> -> vector<8x128xf32>
    %30 = tpu.concatenate %14, %19, %24, %29 in 1 : vector<8x128xf32>, vector<8x128xf32>, vector<8x128xf32>, vector<8x128xf32> -> vector<8x512xf32>
    %c0_19 = arith.constant 0 : index
    %c0_20 = arith.constant 0 : index
    %31 = vector.load %arg6[%c0_19, %c0_20] : memref<1x512xf32, #tpu.memory_space<vmem>>, vector<1x512xf32>
    %32 = vector.broadcast %31 : vector<1x512xf32> to vector<8x512xf32>
    %33 = arith.addf %30, %32 : vector<8x512xf32>
    %cst_21 = arith.constant 2.000000e-01 : f32
    %34 = vector.broadcast %cst_21 : f32 to vector<8x512xf32>
    %35 = arith.mulf %34, %33 : vector<8x512xf32>
    %36 = arith.maximumf %33, %35 : vector<8x512xf32>
    %37 = vector.extract_strided_slice %36 {offsets = [0, 0], sizes = [8, 192], strides = [1, 1]} : vector<8x512xf32> to vector<8x192xf32>
    %38 = arith.truncf %37 : vector<8x192xf32> to vector<8x192xbf16>
    %c0_22 = arith.constant 0 : index
    %c0_23 = arith.constant 0 : index
    %c0_24 = arith.constant 0 : index
    %39 = vector.load %arg4[%c0_22, %c0_23, %c0_24] : memref<8x192x128xbf16, #tpu.memory_space<vmem>>, vector<1x192x128xbf16>
    %40 = vector.shape_cast %39 : vector<1x192x128xbf16> to vector<192x128xbf16>
    %cst_25 = arith.constant dense<0.000000e+00> : vector<8x128xf32>
    %41 = tpu.matmul %38, %40, %cst_25 {dimension_numbers = #tpu.dot_dimension_numbers<[1], [0], [0], [1], [0, 0, 1, 1], [], []>} : vector<8x192xbf16>, vector<192x128xbf16>, vector<8x128xf32> -> vector<8x128xf32>
    %42 = vector.extract_strided_slice %36 {offsets = [0, 0], sizes = [8, 192], strides = [1, 1]} : vector<8x512xf32> to vector<8x192xf32>
    %43 = arith.truncf %42 : vector<8x192xf32> to vector<8x192xbf16>
    %c1_26 = arith.constant 1 : index
    %c0_27 = arith.constant 0 : index
    %c0_28 = arith.constant 0 : index
    %44 = vector.load %arg4[%c1_26, %c0_27, %c0_28] : memref<8x192x128xbf16, #tpu.memory_space<vmem>>, vector<1x192x128xbf16>
    %45 = vector.shape_cast %44 : vector<1x192x128xbf16> to vector<192x128xbf16>
    %cst_29 = arith.constant dense<0.000000e+00> : vector<8x128xf32>
    %46 = tpu.matmul %43, %45, %cst_29 {dimension_numbers = #tpu.dot_dimension_numbers<[1], [0], [0], [1], [0, 0, 1, 1], [], []>} : vector<8x192xbf16>, vector<192x128xbf16>, vector<8x128xf32> -> vector<8x128xf32>
    %47 = vector.extract_strided_slice %36 {offsets = [0, 64], sizes = [8, 192], strides = [1, 1]} : vector<8x512xf32> to vector<8x192xf32>
    %48 = arith.truncf %47 : vector<8x192xf32> to vector<8x192xbf16>
    %c2_30 = arith.constant 2 : index
    %c0_31 = arith.constant 0 : index
    %c0_32 = arith.constant 0 : index
    %49 = vector.load %arg4[%c2_30, %c0_31, %c0_32] : memref<8x192x128xbf16, #tpu.memory_space<vmem>>, vector<1x192x128xbf16>
    %50 = vector.shape_cast %49 : vector<1x192x128xbf16> to vector<192x128xbf16>
    %cst_33 = arith.constant dense<0.000000e+00> : vector<8x128xf32>
    %51 = tpu.matmul %48, %50, %cst_33 {dimension_numbers = #tpu.dot_dimension_numbers<[1], [0], [0], [1], [0, 0, 1, 1], [], []>} : vector<8x192xbf16>, vector<192x128xbf16>, vector<8x128xf32> -> vector<8x128xf32>
    %52 = vector.extract_strided_slice %36 {offsets = [0, 128], sizes = [8, 192], strides = [1, 1]} : vector<8x512xf32> to vector<8x192xf32>
    %53 = arith.truncf %52 : vector<8x192xf32> to vector<8x192xbf16>
    %c3_34 = arith.constant 3 : index
    %c0_35 = arith.constant 0 : index
    %c0_36 = arith.constant 0 : index
    %54 = vector.load %arg4[%c3_34, %c0_35, %c0_36] : memref<8x192x128xbf16, #tpu.memory_space<vmem>>, vector<1x192x128xbf16>
    %55 = vector.shape_cast %54 : vector<1x192x128xbf16> to vector<192x128xbf16>
    %cst_37 = arith.constant dense<0.000000e+00> : vector<8x128xf32>
    %56 = tpu.matmul %53, %55, %cst_37 {dimension_numbers = #tpu.dot_dimension_numbers<[1], [0], [0], [1], [0, 0, 1, 1], [], []>} : vector<8x192xbf16>, vector<192x128xbf16>, vector<8x128xf32> -> vector<8x128xf32>
    %57 = vector.extract_strided_slice %36 {offsets = [0, 192], sizes = [8, 192], strides = [1, 1]} : vector<8x512xf32> to vector<8x192xf32>
    %58 = arith.truncf %57 : vector<8x192xf32> to vector<8x192xbf16>
    %c4 = arith.constant 4 : index
    %c0_38 = arith.constant 0 : index
    %c0_39 = arith.constant 0 : index
    %59 = vector.load %arg4[%c4, %c0_38, %c0_39] : memref<8x192x128xbf16, #tpu.memory_space<vmem>>, vector<1x192x128xbf16>
    %60 = vector.shape_cast %59 : vector<1x192x128xbf16> to vector<192x128xbf16>
    %cst_40 = arith.constant dense<0.000000e+00> : vector<8x128xf32>
    %61 = tpu.matmul %58, %60, %cst_40 {dimension_numbers = #tpu.dot_dimension_numbers<[1], [0], [0], [1], [0, 0, 1, 1], [], []>} : vector<8x192xbf16>, vector<192x128xbf16>, vector<8x128xf32> -> vector<8x128xf32>
    %62 = vector.extract_strided_slice %36 {offsets = [0, 256], sizes = [8, 192], strides = [1, 1]} : vector<8x512xf32> to vector<8x192xf32>
    %63 = arith.truncf %62 : vector<8x192xf32> to vector<8x192xbf16>
    %c5 = arith.constant 5 : index
    %c0_41 = arith.constant 0 : index
    %c0_42 = arith.constant 0 : index
    %64 = vector.load %arg4[%c5, %c0_41, %c0_42] : memref<8x192x128xbf16, #tpu.memory_space<vmem>>, vector<1x192x128xbf16>
    %65 = vector.shape_cast %64 : vector<1x192x128xbf16> to vector<192x128xbf16>
    %cst_43 = arith.constant dense<0.000000e+00> : vector<8x128xf32>
    %66 = tpu.matmul %63, %65, %cst_43 {dimension_numbers = #tpu.dot_dimension_numbers<[1], [0], [0], [1], [0, 0, 1, 1], [], []>} : vector<8x192xbf16>, vector<192x128xbf16>, vector<8x128xf32> -> vector<8x128xf32>
    %67 = vector.extract_strided_slice %36 {offsets = [0, 320], sizes = [8, 192], strides = [1, 1]} : vector<8x512xf32> to vector<8x192xf32>
    %68 = arith.truncf %67 : vector<8x192xf32> to vector<8x192xbf16>
    %c6 = arith.constant 6 : index
    %c0_44 = arith.constant 0 : index
    %c0_45 = arith.constant 0 : index
    %69 = vector.load %arg4[%c6, %c0_44, %c0_45] : memref<8x192x128xbf16, #tpu.memory_space<vmem>>, vector<1x192x128xbf16>
    %70 = vector.shape_cast %69 : vector<1x192x128xbf16> to vector<192x128xbf16>
    %cst_46 = arith.constant dense<0.000000e+00> : vector<8x128xf32>
    %71 = tpu.matmul %68, %70, %cst_46 {dimension_numbers = #tpu.dot_dimension_numbers<[1], [0], [0], [1], [0, 0, 1, 1], [], []>} : vector<8x192xbf16>, vector<192x128xbf16>, vector<8x128xf32> -> vector<8x128xf32>
    %72 = vector.extract_strided_slice %36 {offsets = [0, 320], sizes = [8, 192], strides = [1, 1]} : vector<8x512xf32> to vector<8x192xf32>
    %73 = arith.truncf %72 : vector<8x192xf32> to vector<8x192xbf16>
    %c7 = arith.constant 7 : index
    %c0_47 = arith.constant 0 : index
    %c0_48 = arith.constant 0 : index
    %74 = vector.load %arg4[%c7, %c0_47, %c0_48] : memref<8x192x128xbf16, #tpu.memory_space<vmem>>, vector<1x192x128xbf16>
    %75 = vector.shape_cast %74 : vector<1x192x128xbf16> to vector<192x128xbf16>
    %cst_49 = arith.constant dense<0.000000e+00> : vector<8x128xf32>
    %76 = tpu.matmul %73, %75, %cst_49 {dimension_numbers = #tpu.dot_dimension_numbers<[1], [0], [0], [1], [0, 0, 1, 1], [], []>} : vector<8x192xbf16>, vector<192x128xbf16>, vector<8x128xf32> -> vector<8x128xf32>
    %77 = tpu.concatenate %41, %46, %51, %56, %61, %66, %71, %76 in 1 : vector<8x128xf32>, vector<8x128xf32>, vector<8x128xf32>, vector<8x128xf32>, vector<8x128xf32>, vector<8x128xf32>, vector<8x128xf32>, vector<8x128xf32> -> vector<8x1024xf32>
    %c0_50 = arith.constant 0 : index
    %c0_51 = arith.constant 0 : index
    %78 = vector.load %arg7[%c0_50, %c0_51] : memref<1x1024xf32, #tpu.memory_space<vmem>>, vector<1x1024xf32>
    %79 = vector.broadcast %78 : vector<1x1024xf32> to vector<8x1024xf32>
    %80 = arith.addf %77, %79 : vector<8x1024xf32>
    %cst_52 = arith.constant 0.000000e+00 : f32
    %81 = vector.broadcast %cst_52 : f32 to vector<8x1024xf32>
    %82 = arith.subf %81, %80 : vector<8x1024xf32>
    %83 = math.exp %82 : vector<8x1024xf32>
    %cst_53 = arith.constant 1.000000e+00 : f32
    %84 = vector.broadcast %cst_53 : f32 to vector<8x1024xf32>
    %85 = arith.addf %84, %83 : vector<8x1024xf32>
    %86 = tpu.reciprocal %85 {approx = true} : vector<8x1024xf32> -> vector<8x1024xf32>
    %c0_54 = arith.constant 0 : index
    %c0_55 = arith.constant 0 : index
    %87 = vector.load %arg8[%c0_54, %c0_55] : memref<8x1024xf32, #tpu.memory_space<vmem>>, vector<8x1024xf32>
    tpu.vector_store %arg8[%c0_54, %c0_55], %86 {strides = array<i32>} : memref<8x1024xf32, #tpu.memory_space<vmem>>, vector<8x1024xf32>,
    return
  }
  func.func @transform_0(%arg0: i32) -> (i32, i32) {
    %c0_i32 = arith.constant 0 : i32
    %c0_i32_0 = arith.constant 0 : i32
    %c0_i32_1 = arith.constant 0 : i32
    return %c0_i32, %c0_i32_0 : i32, i32
  }
  func.func @transform_1(%arg0: i32) -> (i32, i32) {
    %c0_i32 = arith.constant 0 : i32
    %c0_i32_0 = arith.constant 0 : i32
    %c0_i32_1 = arith.constant 0 : i32
    return %c0_i32, %c0_i32_0 : i32, i32
  }
  func.func @transform_2(%arg0: i32) -> (i32, i32, i32) {
    %c0_i32 = arith.constant 0 : i32
    %c0_i32_0 = arith.constant 0 : i32
    %c0_i32_1 = arith.constant 0 : i32
    %c0_i32_2 = arith.constant 0 : i32
    return %c0_i32, %c0_i32_0, %c0_i32_1 : i32, i32, i32
  }
  func.func @transform_3(%arg0: i32) -> (i32, i32, i32) {
    %c0_i32 = arith.constant 0 : i32
    %c0_i32_0 = arith.constant 0 : i32
    %c0_i32_1 = arith.constant 0 : i32
    %c0_i32_2 = arith.constant 0 : i32
    return %c0_i32, %c0_i32_0, %c0_i32_1 : i32, i32, i32
  }
  func.func @transform_4(%arg0: i32) -> (i32, i32) {
    %c0_i32 = arith.constant 0 : i32
    %c0_i32_0 = arith.constant 0 : i32
    %c0_i32_1 = arith.constant 0 : i32
    return %c0_i32, %c0_i32_0 : i32, i32
  }
  func.func @transform_5(%arg0: i32) -> (i32, i32) {
    %c0_i32 = arith.constant 0 : i32
    %c0_i32_0 = arith.constant 0 : i32
    %c0_i32_1 = arith.constant 0 : i32
    return %c0_i32, %c0_i32_0 : i32, i32
  }
  func.func @transform_6(%arg0: i32) -> (i32, i32) {
    %c0_i32 = arith.constant 0 : i32
    %c0_i32_0 = arith.constant 0 : i32
    %c0_i32_1 = arith.constant 0 : i32
    return %c0_i32, %c0_i32_0 : i32, i32
  }
  func.func @transform_7(%arg0: i32) -> (i32, i32) {
    %c0_i32 = arith.constant 0 : i32
    %c0_i32_0 = arith.constant 0 : i32
    %c0_i32_1 = arith.constant 0 : i32
    return %c0_i32, %c0_i32_0 : i32, i32
  }
}

</mosaic_0001>

<bundles_post_ra>
// kernel: _lambda_.1
= control target key start
LH: loop header
LB: loop body
LE: loop exit
PB: predicated region body
PF: predicated region fallthrough
CT: control target
= control target key end

     0   :  { %12 = vsyncpa [#allocation3], 0  ;;  %s2724_s0 = inlined_call_operand.vmem [shape: f32[8,32], index: 0, kind: input, shape index: {}]   ;;  %s2725_s1 = inlined_call_operand.vmem [shape: bf16[32,256], index: 1, kind: input, shape index: {}]   ;;  %s2726_s2 = inlined_call_operand.hbm [shape: bf16[4,192,128], index: 2, kind: input, shape index: {}]   ;;  %s2727_s3 = inlined_call_operand.hbm [shape: bf16[8,192,128], index: 3, kind: input, shape index: {}]   ;;  %s2728_s4 = inlined_call_operand.vmem [shape: f32[1,256], index: 4, kind: input, shape index: {}]   ;;  %s2729_s5 = inlined_call_operand.vmem [shape: f32[1,512], index: 5, kind: input, shape index: {}]   ;;  %s2730_s6 = inlined_call_operand.vmem [shape: f32[1,1024], index: 6, kind: input, shape index: {}]   ;;  %s2731_s7 = inlined_call_operand.vmem [shape: f32[8,1024], index: 7, kind: output, shape index: {}]  }
   0x1   :  { %13 = vsyncpa [#allocation5], 0  ;;  %s2376_s24 = smov [#allocation2]   ;;  %s2328_s28 = scalar_lea.hbm %s2726_s2, 6144 }
   0x2   :  { %s23_s25 = sshll.u32 %s2376_s24, 4  ;;  %p2329_p0 = scmp.ne.s32.totalorder %s2726_s2, %s2328_s28  ;;  %s24_s25 = int_to_ptr.vmem [resolvable:$true] %s23_s25 }
   0x3   :  { %p2332_p1 = scmp.lt.u32.totalorder %s2328_s28, %s2726_s2 }
   0x5   :  { %p2334_p2 = pnand %p2332_p1, %p2329_p0 }
   0x7   :  { %2337 = shalt.err (!%p2334_p2)
}
   0x8   :  { %s2338_s10 = scalar_lea.vmem %s24_s25, 6144  ;;  %p2343_p4 = scmp.lt.s32.totalorder %s24_s25, %s24_s25 }
   0x9   :  { %p2339_p3 = scmp.ne.s32.totalorder %s24_s25, %s2338_s10  ;;  %p2344_p5 = scmp.lt.s32.totalorder %s2338_s10, %s2338_s10 }
   0xb   :  { %p2345_p6 = por %p2344_p5, %p2343_p4 }
   0xd   :  { %p2346_p7 = pnand %p2345_p6, %p2339_p3 }
   0xf   :  { %2349 = shalt.err (!%p2346_p7)
}
  0x10   :  { %s2377_s11 = smov 64   ;;  %s2378_s12 = smov 4  }
  0x11   :  { %29 = dma.hbm_to_vmem [thread:$0]  %s2726_s2, 6144, %s24_s25, [#allocation3], %s2377_s11, %s2377_s11, %s2378_s12  }
  0x12   :  { %s2379_s15 = smov [#allocation4]   ;;  %s2350_s19 = scalar_lea.hbm %s2727_s3, 12288 }
  0x13   :  { %s35_s16 = sshll.u32 %s2379_s15, 4  ;;  %p2351_p8 = scmp.ne.s32.totalorder %s2727_s3, %s2350_s19  ;;  %s36_s16 = int_to_ptr.vmem [resolvable:$true] %s35_s16 }
  0x14   :  { %p2354_p9 = scmp.lt.u32.totalorder %s2350_s19, %s2727_s3 }
  0x16   :  { %p2356_p10 = pnand %p2354_p9, %p2351_p8 }
  0x18   :  { %2359 = shalt.err (!%p2356_p10)
}
  0x19   :  { %s2360_s24 = scalar_lea.vmem %s36_s16, 12288  ;;  %p2365_p12 = scmp.lt.s32.totalorder %s36_s16, %s36_s16 }
  0x1a   :  { %p2361_p11 = scmp.ne.s32.totalorder %s36_s16, %s2360_s24  ;;  %p2366_p13 = scmp.lt.s32.totalorder %s2360_s24, %s2360_s24 }
  0x1c   :  { %p2367_p0 = por %p2366_p13, %p2365_p12 }
  0x1e   :  { %p2368_p1 = pnand %p2367_p0, %p2361_p11 }
  0x20   :  { %2371 = shalt.err (!%p2368_p1)
}
  0x21   :  { %41 = dma.hbm_to_vmem [thread:$0]  %s2727_s3, 12288, %s36_s16, [#allocation5], %s2377_s11, %s2377_s11, %s2378_s12  }
  0x22   :  { %2372 = dma.done.wait [#allocation3], 6144  }
  0x23   :  { %2373 = vsyncadd [#allocation3], 4294961152 }
  0x24   :  { %2374 = dma.done.wait [#allocation5], 12288  }
  0x25   :  { %2375 = vsyncadd [#allocation5], 4294955008  ;;  %v2380_v0 = vmov 0   ;;  %v2146_v1 = vld [vmem:[%s2725_s1 + $0x4] ss:$8 sps:$4 sm:$0xff]   ;;  %vm93_vm0 = vcmask 261120   ;;  %v63_v31 = vlaneseq }
  0x26   :  { %129 = vmatprep.mubr.bf16.mxu0 %v2380_v0  ;;  %244 = vmatprep.subr.bf16.mxu1 %v2380_v0  ;;  %v2148_v2 = vld [vmem:[%s2725_s1] ss:$8 sps:$4 sm:$0xff]   ;;  %v2149_v3 = vld [vmem:[%s2725_s1 + $0x14] ss:$8 sps:$4 sm:$0xff]   ;;  %v2151_v4 = vld [vmem:[%s2725_s1 + $0x10] ss:$8 sps:$4 sm:$0xff]  }
  0x27   :  { %97 = vmatprep.subr.bf16.mxu0 %v2146_v1  ;;  %v55_v5 = vld [vmem:[%s2724_s0] sm:$0xff]  ;;  %v2154_v7 = vld [vmem:[#allocation2 + $0x8] sm:$0xff]   ;;  %v2156_v10 = vld [vmem:[#allocation2 + $0x10] sm:$0xff]   ;;  %v2491_v32 = vshrl.u32 %v63_v31, 7  ;;  %vm240_vm1 = vcmask 523264  }
  0x28   :  { %98 = vmatpush1.bf16.msra.mxu0 %v2148_v2  ;;  %v2152_v6 = vld [vmem:[#allocation2] sm:$0xff]   ;;  %v56_v8 = vpack.c.bf16 %v55_v5, %v55_v5  ;;  %v2155_v11 = vld [vmem:[#allocation2 + $0x68] sm:$0xff]   ;;  %v2158_v12 = vld [vmem:[#allocation2 + $0x18] sm:$0xff]  }
  0x29   :  { %99 = vmatprep.subr.bf16.mxu0 %v2149_v3  ;;  %245 = vmatpush1.bf16.msra.mxu1 %v2152_v6  ;;  %v2153_v9 = vld [vmem:[#allocation2 + $0x60] sm:$0xff]   ;;  %v2157_v13 = vld [vmem:[#allocation2 + $0x70] sm:$0xff]   ;;  %v2159_v15 = vld [vmem:[#allocation2 + $0x78] sm:$0xff]   ;;  %v2494_v33 = vsub.s32 0, %v2491_v32  ;;  %v2500_v35 = vsub.s32 1, %v2491_v32 }
  0x2a   :  { %246 = vmatprep.subr.bf16.mxu1 %v2380_v0  ;;  %v2160_v14 = vld [vmem:[#allocation2 + $0x20] sm:$0xff]   ;;  %v2162_v17 = vld [vmem:[#allocation2 + $0x28] sm:$0xff]   ;;  %v2164_v18 = vld [vmem:[#allocation2 + $0x30] sm:$0xff]  }
  0x2b   :  { %v2161_v16 = vld [vmem:[#allocation2 + $0x80] sm:$0xff]   ;;  %v2163_v19 = vld [vmem:[#allocation2 + $0x88] sm:$0xff]   ;;  %v2166_v20 = vld [vmem:[#allocation2 + $0x38] sm:$0xff]  }
  0x2c   :  { %100 = vmatpush1.bf16.msra.mxu0 %v2151_v4  ;;  %v2165_v21 = vld [vmem:[#allocation2 + $0x90] sm:$0xff]   ;;  %v2168_v22 = vld [vmem:[#allocation2 + $0x40] sm:$0xff]   ;;  %v2167_v23 = vld [vmem:[#allocation2 + $0x98] sm:$0xff]  }
  0x2d   :  { %381 = vmatprep.subr.bf16.mxu0 %v2380_v0  ;;  %247 = vmatpush1.bf16.msra.mxu1 %v2154_v7  ;;  %v2169_v24 = vld [vmem:[#allocation2 + $0xa0] sm:$0xff]   ;;  %v2170_v25 = vld [vmem:[#allocation2 + $0x48] sm:$0xff]   ;;  %v2172_v27 = vld [vmem:[#allocation2 + $0x50] sm:$0xff]  }
  0x2e   :  { %248 = vmatprep.subr.bf16.mxu1 %v2380_v0  ;;  %v2171_v26 = vld [vmem:[#allocation2 + $0xa8] sm:$0xff]   ;;  %v2173_v28 = vld [vmem:[#allocation2 + $0xb0] sm:$0xff]   ;;  %v2174_v29 = vld [vmem:[#allocation2 + $0x58] sm:$0xff]  }
  0x2f   :  { %1984 = vmatmul.mubr.msk.bf16.vlgmr.msra.gmra.mrb[0].mxu0 %vm93_vm0, %v56_v8  ;;  %v2175_v30 = vld [vmem:[#allocation2 + $0xb8] sm:$0xff]   ;;  %v61_v34 = vld [vmem:[%s2728_s4] sm:$0x3]  ;;  %v2178_v52 = vld [vmem:[#allocation2 + $0xc8] sm:$0xff]  }
  0x30   :  { %382 = vmatpush1.bf16.msra.mxu0 %v2153_v9  ;;  %v66_v36 = vrot.slane %v61_v34, %v2494_v33  ;;  %v70_v37 = vrot.slane %v61_v34, %v2500_v35  ;;  %v2176_v50 = vld [vmem:[#allocation2 + $0xc0] sm:$0xff]   ;;  %v2179_v53 = vld [vmem:[#allocation2 + $0x128] sm:$0xff]   ;;  %v2180_v54 = vld [vmem:[#allocation2 + $0xd0] sm:$0xff]  }
  0x31   :  { %383 = vmatprep.subr.bf16.mxu0 %v2380_v0  ;;  %249 = vmatpush1.bf16.msra.mxu1 %v2156_v10  ;;  %v2177_v51 = vld [vmem:[#allocation2 + $0x120] sm:$0xff]   ;;  %v2181_v55 = vld [vmem:[#allocation2 + $0x130] sm:$0xff]   ;;  %v2182_v56 = vld [vmem:[#allocation2 + $0xd8] sm:$0xff]  }
  0x32   :  { %250 = vmatprep.subr.bf16.mxu1 %v2380_v0  ;;  %v2183_v57 = vld [vmem:[#allocation2 + $0x138] sm:$0xff]   ;;  %v2184_v58 = vld [vmem:[#allocation2 + $0xe0] sm:$0xff]   ;;  %v2186_v60 = vld [vmem:[#allocation2 + $0xe8] sm:$0xff]  }
  0x33   :  { %v2185_v59 = vld [vmem:[#allocation2 + $0x140] sm:$0xff]   ;;  %v2187_v61 = vld [vmem:[#allocation2 + $0x148] sm:$0xff]   ;;  %v2188_v62 = vld [vmem:[#allocation2 + $0xf0] sm:$0xff]  }
  0x34   :  { %384 = vmatpush1.bf16.msra.mxu0 %v2155_v11  ;;  %v2189_v63 = vld [vmem:[#allocation2 + $0x150] sm:$0xff]   ;;  %v2190_v1 = vld [vmem:[#allocation2 + $0xf8] sm:$0xff]   ;;  %v2192_v3 = vld [vmem:[#allocation2 + $0x100] sm:$0xff]  }
  0x35   :  { %385 = vmatprep.subr.bf16.mxu0 %v2380_v0  ;;  %251 = vmatpush1.bf16.msra.mxu1 %v2158_v12  ;;  %v2191_v2 = vld [vmem:[#allocation2 + $0x158] sm:$0xff]   ;;  %v2193_v4 = vld [vmem:[#allocation2 + $0x160] sm:$0xff]   ;;  %v2194_v5 = vld [vmem:[#allocation2 + $0x108] sm:$0xff]  }
  0x36   :  { %252 = vmatprep.subr.bf16.mxu1 %v2380_v0  ;;  %v2195_v6 = vld [vmem:[#allocation2 + $0x168] sm:$0xff]   ;;  %v2196_v7 = vld [vmem:[#allocation2 + $0x110] sm:$0xff]   ;;  %v2198_v9 = vld [vmem:[#allocation2 + $0x118] sm:$0xff]  }
  0x37   :  { %v2197_v8 = vld [vmem:[#allocation2 + $0x170] sm:$0xff]   ;;  %v2199_v10 = vld [vmem:[#allocation2 + $0x178] sm:$0xff]   ;;  %v2200_v12 = vld [vmem:[#allocation4] sm:$0xff]  }
  0x38   :  { %386 = vmatpush1.bf16.msra.mxu0 %v2157_v13  ;;  %v2201_v13 = vld [vmem:[#allocation4 + $0x60] sm:$0xff]   ;;  %v2218_v34 = vld [vmem:[#allocation4 + $0x48] sm:$0xff]  }
  0x39   :  { %387 = vmatprep.subr.bf16.mxu0 %v2380_v0  ;;  %253 = vmatpush1.bf16.msra.mxu1 %v2160_v14  ;;  %v2217_v31 = vld [vmem:[#allocation4 + $0xa0] sm:$0xff]  }
  0x3a   :  { %254 = vmatprep.subr.bf16.mxu1 %v2380_v0 }
  0x3c   :  { %388 = vmatpush1.bf16.msra.mxu0 %v2159_v15 }
  0x3d   :  { %389 = vmatprep.subr.bf16.mxu0 %v2380_v0  ;;  %255 = vmatpush1.bf16.msra.mxu1 %v2162_v17  ;;  %v2203_v17 = vld [vmem:[#allocation4 + $0x68] sm:$0xff]  }
  0x3e   :  { %256 = vmatprep.subr.bf16.mxu1 %v2380_v0 }
  0x40   :  { %390 = vmatpush1.bf16.msra.mxu0 %v2161_v16  ;;  %v2202_v16 = vld [vmem:[#allocation4 + $0x8] sm:$0xff]  }
  0x41   :  { %391 = vmatprep.subr.bf16.mxu0 %v2380_v0  ;;  %257 = vmatpush1.bf16.msra.mxu1 %v2164_v18  ;;  %v2204_v18 = vld [vmem:[#allocation4 + $0x10] sm:$0xff]  }
  0x42   :  { %258 = vmatprep.subr.bf16.mxu1 %v2380_v0 }
  0x44   :  { %392 = vmatpush1.bf16.msra.mxu0 %v2163_v19  ;;  %v2205_v19 = vld [vmem:[#allocation4 + $0x70] sm:$0xff]  }
  0x45   :  { %393 = vmatprep.subr.bf16.mxu0 %v2380_v0  ;;  %259 = vmatpush1.bf16.msra.mxu1 %v2166_v20  ;;  %v2206_v20 = vld [vmem:[#allocation4 + $0x18] sm:$0xff]  }
  0x46   :  { %260 = vmatprep.subr.bf16.mxu1 %v2380_v0 }
  0x48   :  { %394 = vmatpush1.bf16.msra.mxu0 %v2165_v21  ;;  %v2207_v21 = vld [vmem:[#allocation4 + $0x78] sm:$0xff]  }
  0x49   :  { %395 = vmatprep.subr.bf16.mxu0 %v2380_v0  ;;  %261 = vmatpush1.bf16.msra.mxu1 %v2168_v22  ;;  %v2208_v22 = vld [vmem:[#allocation4 + $0x20] sm:$0xff]  }
  0x4a   :  { %262 = vmatprep.subr.bf16.mxu1 %v2380_v0 }
  0x4c   :  { %396 = vmatpush1.bf16.msra.mxu0 %v2167_v23  ;;  %v2209_v23 = vld [vmem:[#allocation4 + $0x80] sm:$0xff]  }
  0x4d   :  { %397 = vmatprep.subr.bf16.mxu0 %v2380_v0  ;;  %263 = vmatpush1.bf16.msra.mxu1 %v2170_v25  ;;  %v2211_v25 = vld [vmem:[#allocation4 + $0x88] sm:$0xff]  }
  0x4e   :  { %264 = vmatprep.subr.bf16.mxu1 %v2380_v0 }
  0x50   :  { %398 = vmatpush1.bf16.msra.mxu0 %v2169_v24  ;;  %v2210_v24 = vld [vmem:[#allocation4 + $0x28] sm:$0xff]  }
  0x51   :  { %399 = vmatprep.subr.bf16.mxu0 %v2380_v0  ;;  %265 = vmatpush1.bf16.msra.mxu1 %v2172_v27  ;;  %v2213_v27 = vld [vmem:[#allocation4 + $0x90] sm:$0xff]  }
  0x52   :  { %266 = vmatprep.subr.bf16.mxu1 %v2380_v0 }
  0x54   :  { %400 = vmatpush1.bf16.msra.mxu0 %v2171_v26  ;;  %v2212_v26 = vld [vmem:[#allocation4 + $0x30] sm:$0xff]  }
  0x55   :  { %401 = vmatprep.subr.bf16.mxu0 %v2380_v0  ;;  %267 = vmatpush1.bf16.msra.mxu1 %v2174_v29  ;;  %v2215_v29 = vld [vmem:[#allocation4 + $0x98] sm:$0xff]  }
  0x56   :  { %530 = vmatprep.subr.bf16.mxu1 %v2380_v0 }
  0x58   :  { %402 = vmatpush1.bf16.msra.mxu0 %v2173_v28  ;;  %v2214_v28 = vld [vmem:[#allocation4 + $0x38] sm:$0xff]  }
  0x59   :  { %403 = vmatprep.subr.bf16.mxu0 %v2380_v0 }
  0x5c   :  { %404 = vmatpush1.bf16.msra.mxu0 %v2175_v30  ;;  %v2216_v30 = vld [vmem:[#allocation4 + $0x40] sm:$0xff]  }
  0x5d   :  { %667 = vmatprep.subr.bf16.mxu0 %v2380_v0 }
 0x102   :  { %v131_v38 = vpop.f32.mrb[0].mxu0 }
 0x103   :  { %v132_v39 = vadd.f32 %v131_v38, %v66_v36  ;;  %v133_v40 = vpop.f32.mrb[1].mxu0  ;;  %v2219_v36 = vld [vmem:[#allocation4 + $0xa8] sm:$0xff]   ;;  %v2221_v38 = vld [vmem:[#allocation4 + $0xb0] sm:$0xff]  }
 0x104   :  { %v134_v41 = vadd.f32 %v133_v40, %v70_v37  ;;  %v135_v42 = vpop.f32.mrb[2].mxu0  ;;  %v2220_v37 = vld [vmem:[#allocation4 + $0x50] sm:$0xff]   ;;  %v2223_v40 = vld [vmem:[#allocation4 + $0xb8] sm:$0xff]  }
 0x105   :  { %v138_v43 = vmul.f32 0.2, %v132_v39  ;;  %v136_v44 = vpop.f32.mrb[3].mxu0 }
 0x106   :  { %v139_v45 = vmul.f32 0.2, %v134_v41 }
 0x107   :  { %v140_v46 = vmax.f32 %v132_v39, %v138_v43  ;;  %v2222_v39 = vld [vmem:[#allocation4 + $0x58] sm:$0xff]  }
 0x108   :  { %v141_v47 = vmax.f32 %v134_v41, %v139_v45  ;;  %v2562_v41 = vld [vmem:[%s2729_s5] sm:$0xf] }
 0x109   :  { %v142_v48 = vpack.c.bf16 %v140_v46, %v140_v46  ;;  %v712_v42 = vrot.slane %v2562_v41, %v2494_v33  ;;  %v716_v43 = vrot.slane %v2562_v41, %v2500_v35 }
 0x10a   :  { %v143_v49 = vpack.c.bf16 %v141_v47, %v141_v47 }
 0x10b   :  { %448 = vrot.lane.b32.xlu0 %v142_v48, %s2377_s11 }
 0x10c   :  { %1997 = vmatprep.mubr.msk.bf16.mxu1 %vm240_vm1, %v143_v49  ;;  %2010 = vmatprep.mubr.msk.bf16.mxu0 %vm240_vm1, %v143_v49 }
 0x10d   :  { %277 = vmatmul.mubr.bf16.vlgmr.msra.gmra.mrb[0].mxu1 %v142_v48  ;;  %414 = vmatmul.mubr.bf16.vlgmr.msra.gmra.mrb[4].mxu0 %v142_v48 }
 0x10e   :  { %531 = vmatpush1.bf16.msra.mxu1 %v2176_v50  ;;  %668 = vmatpush1.bf16.msra.mxu0 %v2177_v51 }
 0x10f   :  { %450 = vrot.lane.b32.xlu0 %v143_v49, %s2377_s11  ;;  %532 = vmatprep.subr.bf16.mxu1 %v2380_v0 }
 0x110   :  { %669 = vmatprep.subr.bf16.mxu0 %v2380_v0 }
 0x112   :  { %533 = vmatpush1.bf16.msra.mxu1 %v2178_v52  ;;  %670 = vmatpush1.bf16.msra.mxu0 %v2179_v53 }
 0x113   :  { %534 = vmatprep.subr.bf16.mxu1 %v2380_v0  ;;  %671 = vmatprep.subr.bf16.mxu0 %v2380_v0 }
 0x116   :  { %535 = vmatpush1.bf16.msra.mxu1 %v2180_v54  ;;  %672 = vmatpush1.bf16.msra.mxu0 %v2181_v55 }
 0x117   :  { %536 = vmatprep.subr.bf16.mxu1 %v2380_v0  ;;  %673 = vmatprep.subr.bf16.mxu0 %v2380_v0 }
 0x11a   :  { %537 = vmatpush1.bf16.msra.mxu1 %v2182_v56  ;;  %674 = vmatpush1.bf16.msra.mxu0 %v2183_v57 }
 0x11b   :  { %538 = vmatprep.subr.bf16.mxu1 %v2380_v0  ;;  %675 = vmatprep.subr.bf16.mxu0 %v2380_v0 }
 0x11e   :  { %539 = vmatpush1.bf16.msra.mxu1 %v2184_v58  ;;  %676 = vmatpush1.bf16.msra.mxu0 %v2185_v59 }
 0x11f   :  { %540 = vmatprep.subr.bf16.mxu1 %v2380_v0  ;;  %677 = vmatprep.subr.bf16.mxu0 %v2380_v0 }
 0x122   :  { %541 = vmatpush1.bf16.msra.mxu1 %v2186_v60  ;;  %678 = vmatpush1.bf16.msra.mxu0 %v2187_v61  ;;  %v2225_v60 = vld [vmem:[#allocation4 + $0xc0] sm:$0xff]  }
 0x123   :  { %542 = vmatprep.subr.bf16.mxu1 %v2380_v0  ;;  %679 = vmatprep.subr.bf16.mxu0 %v2380_v0  ;;  %v2224_v61 = vld [vmem:[#allocation4 + $0x120] sm:$0xff]  }
 0x126   :  { %543 = vmatpush1.bf16.msra.mxu1 %v2188_v62  ;;  %680 = vmatpush1.bf16.msra.mxu0 %v2189_v63  ;;  %v2227_v62 = vld [vmem:[#allocation4 + $0xc8] sm:$0xff]  }
 0x127   :  { %544 = vmatprep.subr.bf16.mxu1 %v2380_v0  ;;  %681 = vmatprep.subr.bf16.mxu0 %v2380_v0  ;;  %v2226_v63 = vld [vmem:[#allocation4 + $0x128] sm:$0xff]  }
 0x12a   :  { %545 = vmatpush1.bf16.msra.mxu1 %v2190_v1  ;;  %682 = vmatpush1.bf16.msra.mxu0 %v2191_v2  ;;  %v2229_v1 = vld [vmem:[#allocation4 + $0xd0] sm:$0xff]  }
 0x12b   :  { %546 = vmatprep.subr.bf16.mxu1 %v2380_v0  ;;  %683 = vmatprep.subr.bf16.mxu0 %v2380_v0  ;;  %v2228_v2 = vld [vmem:[#allocation4 + $0x130] sm:$0xff]  }
 0x12e   :  { %547 = vmatpush1.bf16.msra.mxu1 %v2192_v3  ;;  %684 = vmatpush1.bf16.msra.mxu0 %v2193_v4  ;;  %v2231_v3 = vld [vmem:[#allocation4 + $0xd8] sm:$0xff]  }
 0x12f   :  { %548 = vmatprep.subr.bf16.mxu1 %v2380_v0  ;;  %685 = vmatprep.subr.bf16.mxu0 %v2380_v0  ;;  %v2230_v4 = vld [vmem:[#allocation4 + $0x138] sm:$0xff]  }
 0x132   :  { %549 = vmatpush1.bf16.msra.mxu1 %v2194_v5  ;;  %686 = vmatpush1.bf16.msra.mxu0 %v2195_v6  ;;  %v2233_v5 = vld [vmem:[#allocation4 + $0xe0] sm:$0xff]  }
 0x133   :  { %550 = vmatprep.subr.bf16.mxu1 %v2380_v0  ;;  %687 = vmatprep.subr.bf16.mxu0 %v2380_v0  ;;  %v2232_v6 = vld [vmem:[#allocation4 + $0x140] sm:$0xff]  }
 0x136   :  { %551 = vmatpush1.bf16.msra.mxu1 %v2196_v7  ;;  %688 = vmatpush1.bf16.msra.mxu0 %v2197_v8  ;;  %v2235_v7 = vld [vmem:[#allocation4 + $0xe8] sm:$0xff]  }
 0x137   :  { %552 = vmatprep.subr.bf16.mxu1 %v2380_v0  ;;  %689 = vmatprep.subr.bf16.mxu0 %v2380_v0  ;;  %v2234_v8 = vld [vmem:[#allocation4 + $0x148] sm:$0xff]  }
 0x13a   :  { %553 = vmatpush1.bf16.msra.mxu1 %v2198_v9  ;;  %690 = vmatpush1.bf16.msra.mxu0 %v2199_v10  ;;  %v2237_v9 = vld [vmem:[#allocation4 + $0xf0] sm:$0xff]  }
 0x13b   :  { %842 = vmatprep.subr.bf16.mxu1 %v2380_v0  ;;  %979 = vmatprep.subr.bf16.mxu0 %v2380_v0  ;;  %v2236_v10 = vld [vmem:[#allocation4 + $0x150] sm:$0xff]  }
 0x17d   :  { %v449_v11 = vpop.permute.xlu0 %448 }
 0x181   :  { %v451_v14 = vpop.permute.xlu0 %450 }
 0x182   :  { %2023 = vmatprep.mubr.msk.bf16.mxu1 %vm240_vm1, %v451_v14  ;;  %2036 = vmatprep.mubr.msk.bf16.mxu0 %vm240_vm1, %v451_v14  ;;  %v453_v15 = vsel %vm240_vm1, %v449_v11, %v451_v14  ;;  %v2239_v11 = vld [vmem:[#allocation4 + $0xf8] sm:$0xff]   ;;  %v2240_v14 = vld [vmem:[#allocation4 + $0x160] sm:$0xff]  }
 0x183   :  { %563 = vmatmul.mubr.bf16.vlgmr.msra.gmra.mrb[4].mxu1 %v453_v15  ;;  %700 = vmatmul.mubr.bf16.vlgmr.msra.gmra.mrb[8].mxu0 %v453_v15  ;;  %v2243_v15 = vld [vmem:[#allocation4 + $0x108] sm:$0xff]  }
 0x184   :  { %843 = vmatpush1.bf16.msra.mxu1 %v2200_v12  ;;  %980 = vmatpush1.bf16.msra.mxu0 %v2201_v13  ;;  %v2238_v12 = vld [vmem:[#allocation4 + $0x158] sm:$0xff]   ;;  %v2241_v13 = vld [vmem:[#allocation4 + $0x100] sm:$0xff]  }
 0x185   :  { %844 = vmatprep.subr.bf16.mxu1 %v2380_v0  ;;  %981 = vmatprep.subr.bf16.mxu0 %v2380_v0 }
 0x188   :  { %845 = vmatpush1.bf16.msra.mxu1 %v2202_v16  ;;  %982 = vmatpush1.bf16.msra.mxu0 %v2203_v17  ;;  %v2242_v16 = vld [vmem:[#allocation4 + $0x168] sm:$0xff]   ;;  %v2245_v17 = vld [vmem:[#allocation4 + $0x110] sm:$0xff]  }
 0x189   :  { %846 = vmatprep.subr.bf16.mxu1 %v2380_v0  ;;  %983 = vmatprep.subr.bf16.mxu0 %v2380_v0 }
 0x18c   :  { %847 = vmatpush1.bf16.msra.mxu1 %v2204_v18  ;;  %984 = vmatpush1.bf16.msra.mxu0 %v2205_v19  ;;  %v2244_v18 = vld [vmem:[#allocation4 + $0x170] sm:$0xff]   ;;  %v2247_v19 = vld [vmem:[#allocation4 + $0x118] sm:$0xff]  }
 0x18d   :  { %848 = vmatprep.subr.bf16.mxu1 %v2380_v0  ;;  %985 = vmatprep.subr.bf16.mxu0 %v2380_v0 }
 0x190   :  { %849 = vmatpush1.bf16.msra.mxu1 %v2206_v20  ;;  %986 = vmatpush1.bf16.msra.mxu0 %v2207_v21  ;;  %v2246_v20 = vld [vmem:[#allocation4 + $0x178] sm:$0xff]   ;;  %v719_v21 = vsub.s32 2, %v2491_v32 }
 0x191   :  { %850 = vmatprep.subr.bf16.mxu1 %v2380_v0  ;;  %987 = vmatprep.subr.bf16.mxu0 %v2380_v0 }
 0x194   :  { %851 = vmatpush1.bf16.msra.mxu1 %v2208_v22  ;;  %988 = vmatpush1.bf16.msra.mxu0 %v2209_v23  ;;  %v723_v22 = vsub.s32 3, %v2491_v32  ;;  %v720_v23 = vrot.slane %v2562_v41, %v719_v21 }
 0x195   :  { %852 = vmatprep.subr.bf16.mxu1 %v2380_v0  ;;  %989 = vmatprep.subr.bf16.mxu0 %v2380_v0 }
 0x198   :  { %853 = vmatpush1.bf16.msra.mxu1 %v2210_v24  ;;  %990 = vmatpush1.bf16.msra.mxu0 %v2211_v25  ;;  %v724_v24 = vrot.slane %v2562_v41, %v723_v22 }
 0x199   :  { %854 = vmatprep.subr.bf16.mxu1 %v2380_v0  ;;  %991 = vmatprep.subr.bf16.mxu0 %v2380_v0 }
 0x19c   :  { %855 = vmatpush1.bf16.msra.mxu1 %v2212_v26  ;;  %992 = vmatpush1.bf16.msra.mxu0 %v2213_v27 }
 0x19d   :  { %856 = vmatprep.subr.bf16.mxu1 %v2380_v0  ;;  %993 = vmatprep.subr.bf16.mxu0 %v2380_v0 }
 0x1a0   :  { %857 = vmatpush1.bf16.msra.mxu1 %v2214_v28  ;;  %994 = vmatpush1.bf16.msra.mxu0 %v2215_v29 }
 0x1a1   :  { %858 = vmatprep.subr.bf16.mxu1 %v2380_v0  ;;  %995 = vmatprep.subr.bf16.mxu0 %v2380_v0 }
 0x1a4   :  { %859 = vmatpush1.bf16.msra.mxu1 %v2216_v30  ;;  %996 = vmatpush1.bf16.msra.mxu0 %v2217_v31 }
 0x1a5   :  { %860 = vmatprep.subr.bf16.mxu1 %v2380_v0  ;;  %997 = vmatprep.subr.bf16.mxu0 %v2380_v0 }
 0x1a8   :  { %861 = vmatpush1.bf16.msra.mxu1 %v2218_v34  ;;  %998 = vmatpush1.bf16.msra.mxu0 %v2219_v36 }
 0x1a9   :  { %862 = vmatprep.subr.bf16.mxu1 %v2380_v0  ;;  %999 = vmatprep.subr.bf16.mxu0 %v2380_v0 }
 0x1ac   :  { %863 = vmatpush1.bf16.msra.mxu1 %v2220_v37  ;;  %1000 = vmatpush1.bf16.msra.mxu0 %v2221_v38 }
 0x1ad   :  { %864 = vmatprep.subr.bf16.mxu1 %v2380_v0  ;;  %1001 = vmatprep.subr.bf16.mxu0 %v2380_v0 }
 0x1b0   :  { %865 = vmatpush1.bf16.msra.mxu1 %v2222_v39  ;;  %1002 = vmatpush1.bf16.msra.mxu0 %v2223_v40 }
 0x1b1   :  { %1268 = vmatprep.subr.bf16.mxu0 %v2380_v0  ;;  %1127 = vmatprep.subr.bf16.mxu1 %v2380_v0 }
 0x1e0   :  { %v278_v44 = vpop.f32.mrb[0].mxu1  ;;  %v415_v45 = vpop.f32.mrb[4].mxu0 }
 0x1e1   :  { %v729_v46 = vadd.f32 %v712_v42, %v278_v44  ;;  %v730_v47 = vadd.f32 %v716_v43, %v415_v45  ;;  %v280_v48 = vpop.f32.mrb[1].mxu1  ;;  %v417_v49 = vpop.f32.mrb[5].mxu0 }
 0x1e2   :  { %v281_v50 = vpop.f32.mrb[2].mxu1  ;;  %v418_v51 = vpop.f32.mrb[6].mxu0  ;;  %v2249_v49 = vld [vmem:[#allocation4 + $0x1e8] sm:$0xff]  }
 0x1e3   :  { %v733_v52 = vmul.f32 0.2, %v729_v46  ;;  %v734_v53 = vmul.f32 0.2, %v730_v47  ;;  %v282_v54 = vpop.f32.mrb[3].mxu1  ;;  %v419_v55 = vpop.f32.mrb[7].mxu0 }
 0x1e4   :  { %v2262_v50 = vld [vmem:[#allocation4 + $0x188] sm:$0xff]   ;;  %v2250_v51 = vld [vmem:[#allocation4 + $0x1f0] sm:$0xff]   ;;  %v2266_v54 = vld [vmem:[#allocation4 + $0x198] sm:$0xff]  }
 0x1e5   :  { %v737_v56 = vmax.f32 %v729_v46, %v733_v52  ;;  %v738_v57 = vmax.f32 %v730_v47, %v734_v53  ;;  %v2248_v46 = vld [vmem:[#allocation4 + $0x1e0] sm:$0xff]   ;;  %v2264_v52 = vld [vmem:[#allocation4 + $0x190] sm:$0xff]   ;;  %v2251_v53 = vld [vmem:[#allocation4 + $0x1f8] sm:$0xff]  }
 0x1e6   :  { %v2260_v47 = vld [vmem:[#allocation4 + $0x180] sm:$0xff]  }
 0x1e7   :  { %v741_v58 = vpack.c.bf16 %v737_v56, %v737_v56  ;;  %v2568_v59 = vpack.c.bf16 %v738_v57, %v738_v57  ;;  %v2252_v55 = vld [vmem:[#allocation4 + $0x200] sm:$0xff]   ;;  %v2253_v57 = vld [vmem:[#allocation4 + $0x208] sm:$0xff]  }
 0x1e8   :  { %v2268_v56 = vld [vmem:[#allocation4 + $0x1a0] sm:$0xff]  }
 0x1e9   :  { %2049 = vmatprep.mubr.msk.bf16.mxu1 %vm240_vm1, %v2568_v59  ;;  %2062 = vmatprep.mubr.msk.bf16.mxu0 %vm240_vm1, %v2568_v59 }
 0x1ea   :  { %1046 = vrot.lane.b32.xlu1 %v741_v58, %s2377_s11  ;;  %875 = vmatmul.mubr.bf16.vlgmr.msra.gmra.mrb[8].mxu1 %v741_v58 }
 0x1eb   :  { %1012 = vmatmul.mubr.bf16.vlgmr.msra.gmra.mrb[12].mxu0 %v741_v58  ;;  %1128 = vmatpush1.bf16.msra.mxu1 %v2225_v60  ;;  %v2270_v58 = vld [vmem:[#allocation4 + $0x1a8] sm:$0xff]   ;;  %v2272_v60 = vld [vmem:[#allocation4 + $0x1b0] sm:$0xff]  }
 0x1ec   :  { %1269 = vmatpush1.bf16.msra.mxu0 %v2224_v61  ;;  %1129 = vmatprep.subr.bf16.mxu1 %v2380_v0  ;;  %v2255_v61 = vld [vmem:[#allocation4 + $0x218] sm:$0xff]  }
 0x1ed   :  { %1270 = vmatprep.subr.bf16.mxu0 %v2380_v0 }
 0x1ee   :  { %1048 = vrot.lane.b32.xlu1 %v2568_v59, %s2377_s11 }
 0x1ef   :  { %1130 = vmatpush1.bf16.msra.mxu1 %v2227_v62  ;;  %v2274_v62 = vld [vmem:[#allocation4 + $0x1b8] sm:$0xff]  }
 0x1f0   :  { %1271 = vmatpush1.bf16.msra.mxu0 %v2226_v63  ;;  %1131 = vmatprep.subr.bf16.mxu1 %v2380_v0  ;;  %v2256_v63 = vld [vmem:[#allocation4 + $0x220] sm:$0xff]  }
 0x1f1   :  { %1272 = vmatprep.subr.bf16.mxu0 %v2380_v0 }
 0x1f3   :  { %1132 = vmatpush1.bf16.msra.mxu1 %v2229_v1  ;;  %v2276_v1 = vld [vmem:[#allocation4 + $0x1c0] sm:$0xff]  }
 0x1f4   :  { %1273 = vmatpush1.bf16.msra.mxu0 %v2228_v2  ;;  %1133 = vmatprep.subr.bf16.mxu1 %v2380_v0  ;;  %v2257_v2 = vld [vmem:[#allocation4 + $0x228] sm:$0xff]  }
 0x1f5   :  { %1274 = vmatprep.subr.bf16.mxu0 %v2380_v0 }
 0x1f7   :  { %1134 = vmatpush1.bf16.msra.mxu1 %v2231_v3  ;;  %v2278_v3 = vld [vmem:[#allocation4 + $0x1c8] sm:$0xff]  }
 0x1f8   :  { %1275 = vmatpush1.bf16.msra.mxu0 %v2230_v4  ;;  %1135 = vmatprep.subr.bf16.mxu1 %v2380_v0  ;;  %v2258_v4 = vld [vmem:[#allocation4 + $0x230] sm:$0xff]  }
 0x1f9   :  { %1276 = vmatprep.subr.bf16.mxu0 %v2380_v0 }
 0x1fb   :  { %1136 = vmatpush1.bf16.msra.mxu1 %v2233_v5  ;;  %v2280_v5 = vld [vmem:[#allocation4 + $0x1d0] sm:$0xff]  }
 0x1fc   :  { %1277 = vmatpush1.bf16.msra.mxu0 %v2232_v6  ;;  %1137 = vmatprep.subr.bf16.mxu1 %v2380_v0  ;;  %v2259_v6 = vld [vmem:[#allocation4 + $0x238] sm:$0xff]  }
 0x1fd   :  { %1278 = vmatprep.subr.bf16.mxu0 %v2380_v0 }
 0x1ff   :  { %1138 = vmatpush1.bf16.msra.mxu1 %v2235_v7  ;;  %v2282_v7 = vld [vmem:[#allocation4 + $0x1d8] sm:$0xff]  }
 0x200   :  { %1279 = vmatpush1.bf16.msra.mxu0 %v2234_v8  ;;  %1139 = vmatprep.subr.bf16.mxu1 %v2380_v0  ;;  %v2261_v8 = vld [vmem:[#allocation4 + $0x2a0] sm:$0xff]  }
 0x201   :  { %1280 = vmatprep.subr.bf16.mxu0 %v2380_v0 }
 0x203   :  { %1140 = vmatpush1.bf16.msra.mxu1 %v2237_v9  ;;  %v2263_v9 = vld [vmem:[#allocation4 + $0x2a8] sm:$0xff]  }
 0x204   :  { %1281 = vmatpush1.bf16.msra.mxu0 %v2236_v10  ;;  %1141 = vmatprep.subr.bf16.mxu1 %v2380_v0  ;;  %v2265_v10 = vld [vmem:[#allocation4 + $0x2b0] sm:$0xff]  }
 0x205   :  { %1282 = vmatprep.subr.bf16.mxu0 %v2380_v0 }
 0x207   :  { %1142 = vmatpush1.bf16.msra.mxu1 %v2239_v11  ;;  %v2267_v11 = vld [vmem:[#allocation4 + $0x2b8] sm:$0xff]  }
 0x208   :  { %1283 = vmatpush1.bf16.msra.mxu0 %v2238_v12  ;;  %1143 = vmatprep.subr.bf16.mxu1 %v2380_v0  ;;  %v2269_v12 = vld [vmem:[#allocation4 + $0x2c0] sm:$0xff]  }
 0x209   :  { %1284 = vmatprep.subr.bf16.mxu0 %v2380_v0 }
 0x20b   :  { %1144 = vmatpush1.bf16.msra.mxu1 %v2241_v13  ;;  %v2271_v13 = vld [vmem:[#allocation4 + $0x2c8] sm:$0xff]  }
 0x20c   :  { %1285 = vmatpush1.bf16.msra.mxu0 %v2240_v14  ;;  %1145 = vmatprep.subr.bf16.mxu1 %v2380_v0  ;;  %v2273_v14 = vld [vmem:[#allocation4 + $0x2d0] sm:$0xff]  }
 0x20d   :  { %1286 = vmatprep.subr.bf16.mxu0 %v2380_v0 }
 0x20f   :  { %1146 = vmatpush1.bf16.msra.mxu1 %v2243_v15  ;;  %v2275_v15 = vld [vmem:[#allocation4 + $0x2d8] sm:$0xff]  }
 0x210   :  { %1287 = vmatpush1.bf16.msra.mxu0 %v2242_v16  ;;  %1147 = vmatprep.subr.bf16.mxu1 %v2380_v0  ;;  %v2277_v16 = vld [vmem:[#allocation4 + $0x2e0] sm:$0xff]  }
 0x211   :  { %1288 = vmatprep.subr.bf16.mxu0 %v2380_v0 }
 0x213   :  { %1148 = vmatpush1.bf16.msra.mxu1 %v2245_v17  ;;  %v2279_v17 = vld [vmem:[#allocation4 + $0x2e8] sm:$0xff]  }
 0x214   :  { %1289 = vmatpush1.bf16.msra.mxu0 %v2244_v18  ;;  %1149 = vmatprep.subr.bf16.mxu1 %v2380_v0  ;;  %v2281_v18 = vld [vmem:[#allocation4 + $0x2f0] sm:$0xff]  }
 0x215   :  { %1290 = vmatprep.subr.bf16.mxu0 %v2380_v0 }
 0x217   :  { %1150 = vmatpush1.bf16.msra.mxu1 %v2247_v19  ;;  %v2661_v19 = vld [vmem:[%s2730_s6] sm:$0xff] }
 0x218   :  { %1291 = vmatpush1.bf16.msra.mxu0 %v2246_v20  ;;  %1413 = vmatprep.subr.bf16.mxu1 %v2380_v0  ;;  %v1881_v20 = vrot.slane %v2661_v19, %v2494_v33 }
 0x219   :  { %1554 = vmatprep.subr.bf16.mxu0 %v2380_v0 }
 0x256   :  { %v564_v25 = vpop.f32.mrb[4].mxu1  ;;  %v701_v26 = vpop.f32.mrb[8].mxu0 }
 0x257   :  { %v731_v27 = vadd.f32 %v720_v23, %v564_v25  ;;  %v732_v28 = vadd.f32 %v724_v24, %v701_v26  ;;  %v566_v29 = vpop.f32.mrb[5].mxu1  ;;  %v703_v30 = vpop.f32.mrb[9].mxu0  ;;  %v2283_v23 = vld [vmem:[#allocation4 + $0x2f8] sm:$0xff]   ;;  %v1885_v24 = vrot.slane %v2661_v19, %v2500_v35 }
 0x258   :  { %v567_v31 = vpop.f32.mrb[6].mxu1  ;;  %v704_v34 = vpop.f32.mrb[10].mxu0 }
 0x259   :  { %v735_v36 = vmul.f32 0.2, %v731_v27  ;;  %v736_v37 = vmul.f32 0.2, %v732_v28  ;;  %v568_v38 = vpop.f32.mrb[7].mxu1  ;;  %v705_v39 = vpop.f32.mrb[11].mxu0 }
 0x25b   :  { %v739_v40 = vmax.f32 %v731_v27, %v735_v36  ;;  %v740_v42 = vmax.f32 %v732_v28, %v736_v37 }
 0x25c   :  { %v1047_v43 = vpop.permute.xlu1 %1046 }
 0x25d   :  { %v2609_v44 = vpack.c.bf16 %v739_v40, %v739_v40  ;;  %v1453_v45 = vpack.c.bf16 %v740_v42, %v740_v42 }
 0x25f   :  { %1620 = vrot.lane.b32.xlu1 %v1453_v45, %s2377_s11  ;;  %1334 = vrot.lane.b32.xlu0 %v2609_v44, %s2377_s11 }
 0x260   :  { %v2614_v41 = vpop.permute.xlu1 %1048  ;;  %2088 = vmatprep.mubr.msk.bf16.mxu0 %vm240_vm1, %v2609_v44 }
 0x261   :  { %2075 = vmatprep.mubr.msk.bf16.mxu1 %vm240_vm1, %v2614_v41  ;;  %1301 = vmatmul.mubr.bf16.vlgmr.msra.gmra.mrb[16].mxu0 %v2568_v59  ;;  %v1050_v48 = vsel %vm240_vm1, %v1047_v43, %v2614_v41  ;;  %v2254_v59 = vld [vmem:[#allocation4 + $0x210] sm:$0xff]  }
 0x262   :  { %1555 = vmatpush1.bf16.msra.mxu0 %v2248_v46  ;;  %1160 = vmatmul.mubr.bf16.vlgmr.msra.gmra.mrb[12].mxu1 %v1050_v48 }
 0x263   :  { %2114 = vmatprep.mubr.msk.bf16.mxu0 %vm240_vm1, %v1453_v45  ;;  %1556 = vmatprep.subr.bf16.mxu0 %v2380_v0  ;;  %v2284_v45 = vld [vmem:[#allocation4 + $0x240] sm:$0xff]  }
 0x264   :  { %1414 = vmatpush1.bf16.msra.mxu1 %v2260_v47 }
 0x265   :  { %1415 = vmatprep.subr.bf16.mxu1 %v2380_v0 }
 0x266   :  { %1557 = vmatpush1.bf16.msra.mxu0 %v2249_v49 }
 0x267   :  { %1558 = vmatprep.subr.bf16.mxu0 %v2380_v0 }
 0x268   :  { %1416 = vmatpush1.bf16.msra.mxu1 %v2262_v50  ;;  %v2285_v50 = vld [vmem:[#allocation4 + $0x248] sm:$0xff]  }
 0x269   :  { %1417 = vmatprep.subr.bf16.mxu1 %v2380_v0 }
 0x26a   :  { %1559 = vmatpush1.bf16.msra.mxu0 %v2250_v51  ;;  %v2286_v51 = vld [vmem:[#allocation4 + $0x250] sm:$0xff]  }
 0x26b   :  { %1560 = vmatprep.subr.bf16.mxu0 %v2380_v0 }
 0x26c   :  { %1418 = vmatpush1.bf16.msra.mxu1 %v2264_v52 }
 0x26d   :  { %1419 = vmatprep.subr.bf16.mxu1 %v2380_v0 }
 0x26e   :  { %1561 = vmatpush1.bf16.msra.mxu0 %v2251_v53  ;;  %v2287_v53 = vld [vmem:[#allocation4 + $0x258] sm:$0xff]  }
 0x26f   :  { %1562 = vmatprep.subr.bf16.mxu0 %v2380_v0 }
 0x270   :  { %1420 = vmatpush1.bf16.msra.mxu1 %v2266_v54  ;;  %v2288_v54 = vld [vmem:[#allocation4 + $0x260] sm:$0xff]  }
 0x271   :  { %1421 = vmatprep.subr.bf16.mxu1 %v2380_v0 }
 0x272   :  { %1563 = vmatpush1.bf16.msra.mxu0 %v2252_v55  ;;  %v2289_v55 = vld [vmem:[#allocation4 + $0x268] sm:$0xff]  }
 0x273   :  { %1564 = vmatprep.subr.bf16.mxu0 %v2380_v0 }
 0x274   :  { %1422 = vmatpush1.bf16.msra.mxu1 %v2268_v56  ;;  %v2290_v56 = vld [vmem:[#allocation4 + $0x270] sm:$0xff]  }
 0x275   :  { %1423 = vmatprep.subr.bf16.mxu1 %v2380_v0 }
 0x276   :  { %1565 = vmatpush1.bf16.msra.mxu0 %v2253_v57  ;;  %v2291_v57 = vld [vmem:[#allocation4 + $0x278] sm:$0xff]  }
 0x277   :  { %1566 = vmatprep.subr.bf16.mxu0 %v2380_v0 }
 0x278   :  { %1424 = vmatpush1.bf16.msra.mxu1 %v2270_v58  ;;  %v2292_v58 = vld [vmem:[#allocation4 + $0x280] sm:$0xff]  }
 0x279   :  { %1425 = vmatprep.subr.bf16.mxu1 %v2380_v0 }
 0x27a   :  { %1567 = vmatpush1.bf16.msra.mxu0 %v2254_v59  ;;  %v2293_v59 = vld [vmem:[#allocation4 + $0x288] sm:$0xff]  }
 0x27b   :  { %1568 = vmatprep.subr.bf16.mxu0 %v2380_v0 }
 0x27c   :  { %1426 = vmatpush1.bf16.msra.mxu1 %v2272_v60  ;;  %v2294_v60 = vld [vmem:[#allocation4 + $0x290] sm:$0xff]  }
 0x27d   :  { %1427 = vmatprep.subr.bf16.mxu1 %v2380_v0 }
 0x27e   :  { %1569 = vmatpush1.bf16.msra.mxu0 %v2255_v61  ;;  %v2295_v61 = vld [vmem:[#allocation4 + $0x298] sm:$0xff]  }
 0x27f   :  { %1570 = vmatprep.subr.bf16.mxu0 %v2380_v0 }
 0x280   :  { %1428 = vmatpush1.bf16.msra.mxu1 %v2274_v62  ;;  %v1893_v62 = vrot.slane %v2661_v19, %v723_v22 }
 0x281   :  { %1429 = vmatprep.subr.bf16.mxu1 %v2380_v0 }
 0x282   :  { %1571 = vmatpush1.bf16.msra.mxu0 %v2256_v63  ;;  %v1889_v63 = vrot.slane %v2661_v19, %v719_v21 }
 0x283   :  { %1572 = vmatprep.subr.bf16.mxu0 %v2380_v0 }
 0x284   :  { %1430 = vmatpush1.bf16.msra.mxu1 %v2276_v1 }
 0x285   :  { %1431 = vmatprep.subr.bf16.mxu1 %v2380_v0 }
 0x286   :  { %1573 = vmatpush1.bf16.msra.mxu0 %v2257_v2 }
 0x287   :  { %1574 = vmatprep.subr.bf16.mxu0 %v2380_v0 }
 0x288   :  { %1432 = vmatpush1.bf16.msra.mxu1 %v2278_v3 }
 0x289   :  { %1433 = vmatprep.subr.bf16.mxu1 %v2380_v0 }
 0x28a   :  { %1575 = vmatpush1.bf16.msra.mxu0 %v2258_v4 }
 0x28b   :  { %1576 = vmatprep.subr.bf16.mxu0 %v2380_v0 }
 0x28c   :  { %1434 = vmatpush1.bf16.msra.mxu1 %v2280_v5 }
 0x28d   :  { %1435 = vmatprep.subr.bf16.mxu1 %v2380_v0 }
 0x28e   :  { %1577 = vmatpush1.bf16.msra.mxu0 %v2259_v6 }
 0x28f   :  { %1836 = vmatprep.subr.bf16.mxu0 %v2380_v0 }
 0x290   :  { %1436 = vmatpush1.bf16.msra.mxu1 %v2282_v7 }
 0x291   :  { %1587 = vmatmul.mubr.bf16.vlgmr.msra.gmra.mrb[20].mxu0 %v2609_v44  ;;  %1699 = vmatprep.subr.bf16.mxu1 %v2380_v0 }
 0x292   :  { %1837 = vmatpush1.bf16.msra.mxu0 %v2261_v8 }
 0x293   :  { %1838 = vmatprep.subr.bf16.mxu0 %v2380_v0 }
 0x296   :  { %1839 = vmatpush1.bf16.msra.mxu0 %v2263_v9 }
 0x297   :  { %1840 = vmatprep.subr.bf16.mxu0 %v2380_v0 }
 0x29a   :  { %1841 = vmatpush1.bf16.msra.mxu0 %v2265_v10 }
 0x29b   :  { %1842 = vmatprep.subr.bf16.mxu0 %v2380_v0 }
 0x29e   :  { %1843 = vmatpush1.bf16.msra.mxu0 %v2267_v11 }
 0x29f   :  { %1844 = vmatprep.subr.bf16.mxu0 %v2380_v0 }
 0x2a2   :  { %1845 = vmatpush1.bf16.msra.mxu0 %v2269_v12 }
 0x2a3   :  { %1846 = vmatprep.subr.bf16.mxu0 %v2380_v0 }
 0x2a6   :  { %1847 = vmatpush1.bf16.msra.mxu0 %v2271_v13 }
 0x2a7   :  { %1848 = vmatprep.subr.bf16.mxu0 %v2380_v0 }
 0x2aa   :  { %1849 = vmatpush1.bf16.msra.mxu0 %v2273_v14 }
 0x2ab   :  { %1850 = vmatprep.subr.bf16.mxu0 %v2380_v0 }
 0x2ae   :  { %1851 = vmatpush1.bf16.msra.mxu0 %v2275_v15 }
 0x2af   :  { %1852 = vmatprep.subr.bf16.mxu0 %v2380_v0 }
 0x2b2   :  { %1853 = vmatpush1.bf16.msra.mxu0 %v2277_v16 }
 0x2b3   :  { %1854 = vmatprep.subr.bf16.mxu0 %v2380_v0 }
 0x2b6   :  { %1855 = vmatpush1.bf16.msra.mxu0 %v2279_v17 }
 0x2b7   :  { %1856 = vmatprep.subr.bf16.mxu0 %v2380_v0 }
 0x2ba   :  { %1857 = vmatpush1.bf16.msra.mxu0 %v2281_v18  ;;  %v1900_v18 = vsub.s32 5, %v2491_v32 }
 0x2bb   :  { %1858 = vmatprep.subr.bf16.mxu0 %v2380_v0 }
 0x2bd   :  { %v876_v25 = vpop.f32.mrb[8].mxu1 }
 0x2be   :  { %v1918_v26 = vadd.f32 %v1881_v20, %v876_v25  ;;  %v1013_v27 = vpop.f32.mrb[12].mxu0  ;;  %v878_v28 = vpop.f32.mrb[9].mxu1  ;;  %1859 = vmatpush1.bf16.msra.mxu0 %v2283_v23  ;;  %v1901_v20 = vrot.slane %v2661_v19, %v1900_v18 }
 0x2bf   :  { %v1919_v29 = vadd.f32 %v1885_v24, %v1013_v27  ;;  %v1015_v30 = vpop.f32.mrb[13].mxu0  ;;  %v879_v31 = vpop.f32.mrb[10].mxu1 }
 0x2c0   :  { %v1926_v34 = vsub.f32 0.0, %v1918_v26  ;;  %v1016_v36 = vpop.f32.mrb[14].mxu0  ;;  %v880_v37 = vpop.f32.mrb[11].mxu1 }
 0x2c1   :  { %v1927_v38 = vsub.f32 0.0, %v1919_v29  ;;  %v1017_v33 = vpop.f32.mrb[15].mxu0  ;;  %v1896_v36 = vsub.s32 4, %v2491_v32  ;;  %v1908_v37 = vsub.s32 7, %v2491_v32 }
 0x2c2   :  { %v1934_v39 = vmul.f32 1.442695, %v1926_v34 }
 0x2c3   :  { %v1936_v40 = vmul.f32 1.442695, %v1927_v38  ;;  %v1897_v38 = vrot.slane %v2661_v19, %v1896_v36  ;;  %v1909_v33 = vrot.slane %v2661_v19, %v1908_v37 }
 0x2c4   :  { %2296 = vpow2.f32 %v1934_v39 }
 0x2c5   :  { %2298 = vpow2.f32 %v1936_v40 }
 0x2ce   :  { %v2297_v35 = vpop.eup %2296 }
 0x2cf   :  { %v2299_v42 = vpop.eup %2298  ;;  %v1950_v43 = vadd.f32 1.0, %v2297_v35 }
 0x2d0   :  { %v1951_v44 = vadd.f32 1.0, %v2299_v42 }
 0x2d1   :  { %2300 = vrcp.f32 %v1950_v43  ;;  %v1621_v46 = vpop.permute.xlu1 %1620  ;;  %v1335_v47 = vpop.permute.xlu0 %1334 }
 0x2d2   :  { %2302 = vrcp.f32 %v1951_v44  ;;  %v1336_v48 = vsel %vm240_vm1, %v2614_v41, %v1335_v47  ;;  %v1622_v49 = vsel %vm240_vm1, %v1335_v47, %v1621_v46  ;;  %2101 = vmatprep.mubr.msk.bf16.mxu1 %vm240_vm1, %v1335_v47  ;;  %2140 = vmatprep.mubr.msk.bf16.mxu0 %vm240_vm1, %v1621_v46 }
 0x2d3   :  { %1446 = vmatmul.mubr.bf16.vlgmr.msra.gmra.mrb[16].mxu1 %v1336_v48  ;;  %1869 = vmatmul.mubr.bf16.vlgmr.msra.gmra.mrb[24].mxu0 %v1622_v49 }
 0x2d4   :  { %1700 = vmatpush1.bf16.msra.mxu1 %v2284_v45  ;;  %2127 = vmatprep.mubr.msk.bf16.mxu1 %vm240_vm1, %v1621_v46 }
 0x2d5   :  { %1701 = vmatprep.subr.bf16.mxu1 %v2380_v0 }
 0x2d8   :  { %1702 = vmatpush1.bf16.msra.mxu1 %v2285_v50 }
 0x2d9   :  { %1703 = vmatprep.subr.bf16.mxu1 %v2380_v0 }
 0x2db   :  { %v2301_v52 = vpop.eup %2300 }
 0x2dc   :  { %v2303_v41 = vpop.eup %2302  ;;  %1966 = vst [vmem:[%s2731_s7] sm:$0xff] %v2301_v52  ;;  %1704 = vmatpush1.bf16.msra.mxu1 %v2286_v51 }
 0x2dd   :  { %1967 = vst [vmem:[%s2731_s7 + $0x8] sm:$0xff] %v2303_v41  ;;  %1705 = vmatprep.subr.bf16.mxu1 %v2380_v0 }
 0x2e0   :  { %1706 = vmatpush1.bf16.msra.mxu1 %v2287_v53 }
 0x2e1   :  { %1707 = vmatprep.subr.bf16.mxu1 %v2380_v0 }
 0x2e4   :  { %1708 = vmatpush1.bf16.msra.mxu1 %v2288_v54 }
 0x2e5   :  { %1709 = vmatprep.subr.bf16.mxu1 %v2380_v0 }
 0x2e8   :  { %1710 = vmatpush1.bf16.msra.mxu1 %v2289_v55 }
 0x2e9   :  { %1711 = vmatprep.subr.bf16.mxu1 %v2380_v0 }
 0x2ec   :  { %1712 = vmatpush1.bf16.msra.mxu1 %v2290_v56 }
 0x2ed   :  { %1713 = vmatprep.subr.bf16.mxu1 %v2380_v0 }
 0x2f0   :  { %1714 = vmatpush1.bf16.msra.mxu1 %v2291_v57 }
 0x2f1   :  { %1715 = vmatprep.subr.bf16.mxu1 %v2380_v0 }
 0x2f4   :  { %1716 = vmatpush1.bf16.msra.mxu1 %v2292_v58  ;;  %v1904_v58 = vsub.s32 6, %v2491_v32 }
 0x2f5   :  { %1717 = vmatprep.subr.bf16.mxu1 %v2380_v0 }
 0x2f8   :  { %1718 = vmatpush1.bf16.msra.mxu1 %v2293_v59  ;;  %v1905_v59 = vrot.slane %v2661_v19, %v1904_v58 }
 0x2f9   :  { %1719 = vmatprep.subr.bf16.mxu1 %v2380_v0 }
 0x2fc   :  { %1720 = vmatpush1.bf16.msra.mxu1 %v2294_v60 }
 0x2fd   :  { %1721 = vmatprep.subr.bf16.mxu1 %v2380_v0 }
 0x300   :  { %1722 = vmatpush1.bf16.msra.mxu1 %v2295_v61 }
 0x303   :  { %1732 = vmatmul.mubr.bf16.vlgmr.msra.gmra.mrb[20].mxu1 %v1622_v49 }
 0x334   :  { %v1302_v1 = vpop.f32.mrb[16].mxu0 }
 0x335   :  { %v1921_v2 = vadd.f32 %v1893_v62, %v1302_v1  ;;  %v1161_v3 = vpop.f32.mrb[12].mxu1  ;;  %v1304_v4 = vpop.f32.mrb[17].mxu0 }
 0x336   :  { %v1920_v5 = vadd.f32 %v1889_v63, %v1161_v3  ;;  %v1163_v6 = vpop.f32.mrb[13].mxu1  ;;  %v1305_v7 = vpop.f32.mrb[18].mxu0 }
 0x337   :  { %v1929_v8 = vsub.f32 0.0, %v1921_v2  ;;  %v1164_v9 = vpop.f32.mrb[14].mxu1  ;;  %v1306_v0 = vpop.f32.mrb[19].mxu0 }
 0x338   :  { %v1928_v10 = vsub.f32 0.0, %v1920_v5  ;;  %v1165_v11 = vpop.f32.mrb[15].mxu1 }
 0x339   :  { %v1940_v12 = vmul.f32 1.442695, %v1929_v8 }
 0x33a   :  { %v1938_v13 = vmul.f32 1.442695, %v1928_v10 }
 0x33b   :  { %2304 = vpow2.f32 %v1940_v12 }
 0x33c   :  { %2306 = vpow2.f32 %v1938_v13 }
 0x345   :  { %v2305_v22 = vpop.eup %2304 }
 0x346   :  { %v2307_v14 = vpop.eup %2306  ;;  %v1953_v15 = vadd.f32 1.0, %v2305_v22 }
 0x347   :  { %v1952_v21 = vadd.f32 1.0, %v2307_v14 }
 0x348   :  { %2308 = vrcp.f32 %v1953_v15 }
 0x349   :  { %2310 = vrcp.f32 %v1952_v21 }
 0x352   :  { %v2309_v16 = vpop.eup %2308 }
 0x353   :  { %v2311_v17 = vpop.eup %2310  ;;  %1969 = vst [vmem:[%s2731_s7 + $0x18] sm:$0xff] %v2309_v16 }
 0x354   :  { %1968 = vst [vmem:[%s2731_s7 + $0x10] sm:$0xff] %v2311_v17 }
 0x364   :  { %v1588_v23 = vpop.f32.mrb[20].mxu0 }
 0x365   :  { %v1923_v24 = vadd.f32 %v1901_v20, %v1588_v23  ;;  %v1590_v25 = vpop.f32.mrb[21].mxu0 }
 0x366   :  { %v1591_v26 = vpop.f32.mrb[22].mxu0 }
 0x367   :  { %v1931_v27 = vsub.f32 0.0, %v1923_v24  ;;  %v1592_v28 = vpop.f32.mrb[23].mxu0 }
 0x369   :  { %v1944_v29 = vmul.f32 1.442695, %v1931_v27 }
 0x36b   :  { %2312 = vpow2.f32 %v1944_v29 }
 0x375   :  { %v2313_v30 = vpop.eup %2312 }
 0x376   :  { %v1955_v31 = vadd.f32 1.0, %v2313_v30 }
 0x378   :  { %2314 = vrcp.f32 %v1955_v31 }
 0x382   :  { %v2315_v34 = vpop.eup %2314 }
 0x383   :  { %1971 = vst [vmem:[%s2731_s7 + $0x28] sm:$0xff] %v2315_v34 }
 0x3a6   :  { %v1447_v39 = vpop.f32.mrb[16].mxu1  ;;  %v1870_v40 = vpop.f32.mrb[24].mxu0 }
 0x3a7   :  { %v1922_v35 = vadd.f32 %v1897_v38, %v1447_v39  ;;  %v1925_v42 = vadd.f32 %v1909_v33, %v1870_v40  ;;  %v1449_v43 = vpop.f32.mrb[17].mxu1  ;;  %v1872_v44 = vpop.f32.mrb[25].mxu0 }
 0x3a8   :  { %v1450_v45 = vpop.f32.mrb[18].mxu1  ;;  %v1873_v46 = vpop.f32.mrb[26].mxu0 }
 0x3a9   :  { %v1930_v47 = vsub.f32 0.0, %v1922_v35  ;;  %v1933_v48 = vsub.f32 0.0, %v1925_v42  ;;  %v1451_v49 = vpop.f32.mrb[19].mxu1  ;;  %v1874_v50 = vpop.f32.mrb[27].mxu0 }
 0x3ab   :  { %v1942_v51 = vmul.f32 1.442695, %v1930_v47  ;;  %v1948_v52 = vmul.f32 1.442695, %v1933_v48 }
 0x3ad   :  { %2316 = vpow2.f32 %v1942_v51 }
 0x3ae   :  { %2318 = vpow2.f32 %v1948_v52 }
 0x3b7   :  { %v2317_v41 = vpop.eup %2316 }
 0x3b8   :  { %v2319_v53 = vpop.eup %2318  ;;  %v1954_v54 = vadd.f32 1.0, %v2317_v41 }
 0x3b9   :  { %v1957_v55 = vadd.f32 1.0, %v2319_v53 }
 0x3ba   :  { %2320 = vrcp.f32 %v1954_v54 }
 0x3bb   :  { %2322 = vrcp.f32 %v1957_v55 }
 0x3c4   :  { %v2321_v56 = vpop.eup %2320 }
 0x3c5   :  { %v2323_v57 = vpop.eup %2322  ;;  %1970 = vst [vmem:[%s2731_s7 + $0x20] sm:$0xff] %v2321_v56 }
 0x3c6   :  { %1973 = vst [vmem:[%s2731_s7 + $0x38] sm:$0xff] %v2323_v57 }
 0x3d6   :  { %v1733_v60 = vpop.f32.mrb[20].mxu1 }
 0x3d7   :  { %v1924_v61 = vadd.f32 %v1905_v59, %v1733_v60  ;;  %v1735_v62 = vpop.f32.mrb[21].mxu1 }
 0x3d8   :  { %v1736_v63 = vpop.f32.mrb[22].mxu1 }
 0x3d9   :  { %v1932_v1 = vsub.f32 0.0, %v1924_v61  ;;  %v1737_v2 = vpop.f32.mrb[23].mxu1 }
 0x3db   :  { %v1946_v3 = vmul.f32 1.442695, %v1932_v1 }
 0x3dd   :  { %2324 = vpow2.f32 %v1946_v3 }
 0x3e7   :  { %v2325_v4 = vpop.eup %2324 }
 0x3e8   :  { %v1956_v5 = vadd.f32 1.0, %v2325_v4 }
 0x3ea   :  { %2326 = vrcp.f32 %v1956_v5 }
 0x3f4   :  { %v2327_v6 = vpop.eup %2326 }
 0x3f5   :  { %1972 = vst [vmem:[%s2731_s7 + $0x30] sm:$0xff] %v2327_v6 }
 0x3f6   :  { %1978 = vsyncpa [#allocation3], 1 }
 0x3f7   :  { %1979 = vsyncpa [#allocation5], 1 }

</bundles_post_ra>
